<compile_context>
chip_gen: v7x
topology: tpu7x:2x2x1
jax: 0.10.0
libtpu: 0.0.40
codegen_flags: <defaults>
</compile_context>

<pallas_src>
import jax
import jax.numpy as jnp
from jax import lax
from jax.experimental import pallas as pl
from jax.experimental.pallas import tpu as pltpu

# ---- model hyper-parameters (small, consistent with the module's __init__) ----
EMBED_DIM = 32          # embedding_dim
HIDDEN_DIM = 32         # hidden_dim  (== EMBED_DIM so layer weights stack cleanly)
N_LAYERS = 2            # n_layers
VOCAB_SIZE = 50         # vocab_size
TAGSET_SIZE = 8         # tagset_size
SEQ_LEN = 8             # len(sentence)


def lstm_tagger_kernel(ids_ref, emb_ref, w_ih_ref, w_hh_ref, b_ref,
                       w_out_ref, b_out_ref, out_ref, seq_scratch, xproj_scratch):
    T, H = seq_scratch.shape

    # --- embedding gather inside the kernel: seed the sequence buffer ---
    for t in range(T):                                    # T static -> unrolled copies
        idx = ids_ref[t]                                  # scalar from SMEM
        seq_scratch[pl.ds(t, 1), :] = emb_ref[pl.ds(idx, 1), :]

    # zero hidden/cell init (self.init_hidden()), hoisted out of the layer loop
    h0 = jnp.zeros((1, H), jnp.float32)
    c0 = jnp.zeros((1, H), jnp.float32)

    # --- stacked LSTM: python loop over layers (static), unrolled loop over time ---
    for layer in range(N_LAYERS):
        w_ih = w_ih_ref[layer]   # (In, 4H) bf16
        w_hh = w_hh_ref[layer]   # (H, 4H)  bf16
        b = b_ref[layer]         # (1, 4H)  f32

        # Hoisted input projection, bias folded in: one batched (T, 4H) matmul.
        xproj_scratch[...] = (
            jnp.dot(seq_scratch[...].astype(jnp.bfloat16), w_ih,
                    preferred_element_type=jnp.float32)
            + b)

        def step(t, carry, w_hh=w_hh):
            h, c = carry                                   # (1, H) f32 each
            gates = (xproj_scratch[pl.ds(t, 1), :]
                     + jnp.dot(h.astype(jnp.bfloat16), w_hh,
                               preferred_element_type=jnp.float32))   # (1, 4H)
            # Two full-width EUP passes, slice afterwards.
            s = jax.nn.sigmoid(gates)
            tg = jnp.tanh(gates)
            # PyTorch gate order: input, forget, cell(g), output
            i_g = s[:, 0 * H:1 * H]
            f_g = s[:, 1 * H:2 * H]
            g_g = tg[:, 2 * H:3 * H]
            o_g = s[:, 3 * H:4 * H]
            c_new = f_g * c + i_g * g_g
            h_new = o_g * jnp.tanh(c_new)
            # this layer's output becomes next layer's input
            seq_scratch[pl.ds(t, 1), :] = h_new
            return (h_new, c_new)

        lax.fori_loop(0, T, step, (h0, c0), unroll=True)

    # --- hidden2tag linear + log_softmax(dim=1) ---
    tag_space = (jnp.dot(seq_scratch[...].astype(jnp.bfloat16), w_out_ref[...],
                         preferred_element_type=jnp.float32)
                 + b_out_ref[...])                         # (T, TAG)
    m = jnp.max(tag_space, axis=1, keepdims=True)
    z = tag_space - m
    lse = jnp.log(jnp.sum(jnp.exp(z), axis=1, keepdims=True))
    out_ref[...] = z - lse


def lstm_tagger_forward(sentence, params):
    """sentence: (T,) int32 token ids. Returns (T, TAGSET_SIZE) log-probs."""
    emb_table, w_ih_t, w_hh_t, b_gates, w_out_t, b_out = params
    assert EMBED_DIM == HIDDEN_DIM, "stacked-weight layout requires E == H"

    T = sentence.shape[0]
    vmem = pl.BlockSpec(memory_space=pltpu.MemorySpace.VMEM)
    smem = pl.BlockSpec(memory_space=pltpu.MemorySpace.SMEM)
    return pl.pallas_call(
        lstm_tagger_kernel,
        out_shape=jax.ShapeDtypeStruct((T, TAGSET_SIZE), jnp.float32),
        in_specs=[smem, vmem, vmem, vmem, vmem, vmem, vmem],
        out_specs=vmem,
        scratch_shapes=[
            pltpu.VMEM((T, HIDDEN_DIM), jnp.float32),        # sequence buffer
            pltpu.VMEM((T, 4 * HIDDEN_DIM), jnp.float32),    # hoisted x @ W_ih + b
        ],
    )(sentence, emb_table, w_ih_t, w_hh_t, b_gates, w_out_t, b_out)


def init_params(key):
    """Deterministic synthetic parameters (PyTorch-style uniform init scale)."""
    ks = jax.random.split(key, 8)
    bound = 1.0 / jnp.sqrt(jnp.float32(HIDDEN_DIM))

    emb_table = jax.random.normal(ks[0], (VOCAB_SIZE, EMBED_DIM), jnp.float32)

    # stacked LSTM weights; layer 0 input dim == EMBED_DIM == HIDDEN_DIM
    w_ih = jax.random.uniform(ks[1], (N_LAYERS, 4 * HIDDEN_DIM, HIDDEN_DIM),
                              jnp.float32, -bound, bound)
    w_hh = jax.random.uniform(ks[2], (N_LAYERS, 4 * HIDDEN_DIM, HIDDEN_DIM),
                              jnp.float32, -bound, bound)
    b_ih = jax.random.uniform(ks[3], (N_LAYERS, 4 * HIDDEN_DIM),
                              jnp.float32, -bound, bound)
    b_hh = jax.random.uniform(ks[4], (N_LAYERS, 4 * HIDDEN_DIM),
                              jnp.float32, -bound, bound)

    w_out = jax.random.uniform(ks[5], (TAGSET_SIZE, HIDDEN_DIM),
                               jnp.float32, -bound, bound)
    b_out = jax.random.uniform(ks[6], (TAGSET_SIZE,),
                               jnp.float32, -bound, bound)

    # pre-transpose / combine / cast for the kernel layout
    w_ih_t = jnp.transpose(w_ih, (0, 2, 1)).astype(jnp.bfloat16)   # (L, In, 4H)
    w_hh_t = jnp.transpose(w_hh, (0, 2, 1)).astype(jnp.bfloat16)   # (L, H, 4H)
    b_gates = (b_ih + b_hh)[:, None, :].astype(jnp.float32)        # (L, 1, 4H)
    w_out_t = w_out.T.astype(jnp.bfloat16)                         # (H, TAG)
    b_out2 = b_out[None, :].astype(jnp.float32)                    # (1, TAG)
    return (emb_table, w_ih_t, w_hh_t, b_gates, w_out_t, b_out2)


if __name__ == "__main__":
    key = jax.random.PRNGKey(0)
    pkey, skey = jax.random.split(key)

    params = init_params(pkey)
    sentence = jax.random.randint(skey, (SEQ_LEN,), 0, VOCAB_SIZE, dtype=jnp.int32)

    tag_scores = lstm_tagger_forward(sentence, params)
    jax.block_until_ready(tag_scores)

    assert tag_scores.shape == (SEQ_LEN, TAGSET_SIZE)
    # rows of log_softmax must exp-sum to 1
    row_sums = jnp.sum(jnp.exp(tag_scores), axis=1)
    assert jnp.allclose(row_sums, 1.0, atol=1e-3)
    assert bool(jnp.all(jnp.isfinite(tag_scores)))

    print("KERNEL_OK")
</pallas_src>

<mosaic_0001>
module attributes {stable_mosaic.version = 11 : i64} {
  func.func @lstm_tagger_kernel(%arg0: memref<8xi32, #tpu.memory_space<smem>>, %arg1: memref<50x32xf32, #tpu.memory_space<vmem>>, %arg2: memref<2x32x128xbf16, #tpu.memory_space<vmem>>, %arg3: memref<2x32x128xbf16, #tpu.memory_space<vmem>>, %arg4: memref<2x1x128xf32, #tpu.memory_space<vmem>>, %arg5: memref<32x8xbf16, #tpu.memory_space<vmem>>, %arg6: memref<1x8xf32, #tpu.memory_space<vmem>>, %arg7: memref<8x8xf32, #tpu.memory_space<vmem>>, %arg8: memref<8x32xf32, #tpu.memory_space<vmem>>, %arg9: memref<8x128xf32, #tpu.memory_space<vmem>>) attributes {dimension_semantics = [], scalar_prefetch = 0 : i64, scratch_operands = 2 : i64, tpu.core_type = #tpu.core_type<tc>} {
    %c0 = arith.constant 0 : index
    %0 = memref.load %arg0[%c0] : memref<8xi32, #tpu.memory_space<smem>>
    %1 = arith.index_cast %0 : i32 to index
    %c0_0 = arith.constant 0 : index
    %2 = vector.load %arg1[%1, %c0_0] : memref<50x32xf32, #tpu.memory_space<vmem>>, vector<1x32xf32>
    %c0_1 = arith.constant 0 : index
    %c0_2 = arith.constant 0 : index
    %3 = vector.load %arg8[%c0_1, %c0_2] : memref<8x32xf32, #tpu.memory_space<vmem>>, vector<1x32xf32>
    tpu.vector_store %arg8[%c0_1, %c0_2], %2 {strides = array<i32>} : memref<8x32xf32, #tpu.memory_space<vmem>>, vector<1x32xf32>,
    %c1 = arith.constant 1 : index
    %4 = memref.load %arg0[%c1] : memref<8xi32, #tpu.memory_space<smem>>
    %5 = arith.index_cast %4 : i32 to index
    %c0_3 = arith.constant 0 : index
    %6 = vector.load %arg1[%5, %c0_3] : memref<50x32xf32, #tpu.memory_space<vmem>>, vector<1x32xf32>
    %c1_4 = arith.constant 1 : index
    %c0_5 = arith.constant 0 : index
    %7 = vector.load %arg8[%c1_4, %c0_5] : memref<8x32xf32, #tpu.memory_space<vmem>>, vector<1x32xf32>
    tpu.vector_store %arg8[%c1_4, %c0_5], %6 {strides = array<i32>} : memref<8x32xf32, #tpu.memory_space<vmem>>, vector<1x32xf32>,
    %c2 = arith.constant 2 : index
    %8 = memref.load %arg0[%c2] : memref<8xi32, #tpu.memory_space<smem>>
    %9 = arith.index_cast %8 : i32 to index
    %c0_6 = arith.constant 0 : index
    %10 = vector.load %arg1[%9, %c0_6] : memref<50x32xf32, #tpu.memory_space<vmem>>, vector<1x32xf32>
    %c2_7 = arith.constant 2 : index
    %c0_8 = arith.constant 0 : index
    %11 = vector.load %arg8[%c2_7, %c0_8] : memref<8x32xf32, #tpu.memory_space<vmem>>, vector<1x32xf32>
    tpu.vector_store %arg8[%c2_7, %c0_8], %10 {strides = array<i32>} : memref<8x32xf32, #tpu.memory_space<vmem>>, vector<1x32xf32>,
    %c3 = arith.constant 3 : index
    %12 = memref.load %arg0[%c3] : memref<8xi32, #tpu.memory_space<smem>>
    %13 = arith.index_cast %12 : i32 to index
    %c0_9 = arith.constant 0 : index
    %14 = vector.load %arg1[%13, %c0_9] : memref<50x32xf32, #tpu.memory_space<vmem>>, vector<1x32xf32>
    %c3_10 = arith.constant 3 : index
    %c0_11 = arith.constant 0 : index
    %15 = vector.load %arg8[%c3_10, %c0_11] : memref<8x32xf32, #tpu.memory_space<vmem>>, vector<1x32xf32>
    tpu.vector_store %arg8[%c3_10, %c0_11], %14 {strides = array<i32>} : memref<8x32xf32, #tpu.memory_space<vmem>>, vector<1x32xf32>,
    %c4 = arith.constant 4 : index
    %16 = memref.load %arg0[%c4] : memref<8xi32, #tpu.memory_space<smem>>
    %17 = arith.index_cast %16 : i32 to index
    %c0_12 = arith.constant 0 : index
    %18 = vector.load %arg1[%17, %c0_12] : memref<50x32xf32, #tpu.memory_space<vmem>>, vector<1x32xf32>
    %c4_13 = arith.constant 4 : index
    %c0_14 = arith.constant 0 : index
    %19 = vector.load %arg8[%c4_13, %c0_14] : memref<8x32xf32, #tpu.memory_space<vmem>>, vector<1x32xf32>
    tpu.vector_store %arg8[%c4_13, %c0_14], %18 {strides = array<i32>} : memref<8x32xf32, #tpu.memory_space<vmem>>, vector<1x32xf32>,
    %c5 = arith.constant 5 : index
    %20 = memref.load %arg0[%c5] : memref<8xi32, #tpu.memory_space<smem>>
    %21 = arith.index_cast %20 : i32 to index
    %c0_15 = arith.constant 0 : index
    %22 = vector.load %arg1[%21, %c0_15] : memref<50x32xf32, #tpu.memory_space<vmem>>, vector<1x32xf32>
    %c5_16 = arith.constant 5 : index
    %c0_17 = arith.constant 0 : index
    %23 = vector.load %arg8[%c5_16, %c0_17] : memref<8x32xf32, #tpu.memory_space<vmem>>, vector<1x32xf32>
    tpu.vector_store %arg8[%c5_16, %c0_17], %22 {strides = array<i32>} : memref<8x32xf32, #tpu.memory_space<vmem>>, vector<1x32xf32>,
    %c6 = arith.constant 6 : index
    %24 = memref.load %arg0[%c6] : memref<8xi32, #tpu.memory_space<smem>>
    %25 = arith.index_cast %24 : i32 to index
    %c0_18 = arith.constant 0 : index
    %26 = vector.load %arg1[%25, %c0_18] : memref<50x32xf32, #tpu.memory_space<vmem>>, vector<1x32xf32>
    %c6_19 = arith.constant 6 : index
    %c0_20 = arith.constant 0 : index
    %27 = vector.load %arg8[%c6_19, %c0_20] : memref<8x32xf32, #tpu.memory_space<vmem>>, vector<1x32xf32>
    tpu.vector_store %arg8[%c6_19, %c0_20], %26 {strides = array<i32>} : memref<8x32xf32, #tpu.memory_space<vmem>>, vector<1x32xf32>,
    %c7 = arith.constant 7 : index
    %28 = memref.load %arg0[%c7] : memref<8xi32, #tpu.memory_space<smem>>
    %29 = arith.index_cast %28 : i32 to index
    %c0_21 = arith.constant 0 : index
    %30 = vector.load %arg1[%29, %c0_21] : memref<50x32xf32, #tpu.memory_space<vmem>>, vector<1x32xf32>
    %c7_22 = arith.constant 7 : index
    %c0_23 = arith.constant 0 : index
    %31 = vector.load %arg8[%c7_22, %c0_23] : memref<8x32xf32, #tpu.memory_space<vmem>>, vector<1x32xf32>
    tpu.vector_store %arg8[%c7_22, %c0_23], %30 {strides = array<i32>} : memref<8x32xf32, #tpu.memory_space<vmem>>, vector<1x32xf32>,
    %cst = arith.constant 0.000000e+00 : f32
    %32 = vector.broadcast %cst : f32 to vector<1x32xf32>
    %cst_24 = arith.constant 0.000000e+00 : f32
    %33 = vector.broadcast %cst_24 : f32 to vector<1x32xf32>
    %c0_25 = arith.constant 0 : index
    %c0_26 = arith.constant 0 : index
    %c0_27 = arith.constant 0 : index
    %34 = vector.load %arg2[%c0_25, %c0_26, %c0_27] : memref<2x32x128xbf16, #tpu.memory_space<vmem>>, vector<1x32x128xbf16>
    %35 = vector.shape_cast %34 : vector<1x32x128xbf16> to vector<32x128xbf16>
    %c0_28 = arith.constant 0 : index
    %c0_29 = arith.constant 0 : index
    %c0_30 = arith.constant 0 : index
    %36 = vector.load %arg3[%c0_28, %c0_29, %c0_30] : memref<2x32x128xbf16, #tpu.memory_space<vmem>>, vector<1x32x128xbf16>
    %37 = vector.shape_cast %36 : vector<1x32x128xbf16> to vector<32x128xbf16>
    %c0_31 = arith.constant 0 : index
    %c0_32 = arith.constant 0 : index
    %c0_33 = arith.constant 0 : index
    %38 = vector.load %arg4[%c0_31, %c0_32, %c0_33] : memref<2x1x128xf32, #tpu.memory_space<vmem>>, vector<1x1x128xf32>
    %39 = vector.shape_cast %38 : vector<1x1x128xf32> to vector<1x128xf32>
    %c0_34 = arith.constant 0 : index
    %c0_35 = arith.constant 0 : index
    %40 = vector.load %arg8[%c0_34, %c0_35] : memref<8x32xf32, #tpu.memory_space<vmem>>, vector<8x32xf32>
    %41 = arith.truncf %40 : vector<8x32xf32> to vector<8x32xbf16>
    %cst_36 = arith.constant dense<0.000000e+00> : vector<8x128xf32>
    %42 = tpu.matmul %41, %35, %cst_36 {dimension_numbers = #tpu.dot_dimension_numbers<[1], [0], [0], [1], [0, 0, 1, 1], [], []>} : vector<8x32xbf16>, vector<32x128xbf16>, vector<8x128xf32> -> vector<8x128xf32>
    %43 = vector.broadcast %39 : vector<1x128xf32> to vector<8x128xf32>
    %44 = arith.addf %42, %43 : vector<8x128xf32>
    %c0_37 = arith.constant 0 : index
    %c0_38 = arith.constant 0 : index
    %45 = vector.load %arg9[%c0_37, %c0_38] : memref<8x128xf32, #tpu.memory_space<vmem>>, vector<8x128xf32>
    tpu.vector_store %arg9[%c0_37, %c0_38], %44 {strides = array<i32>} : memref<8x128xf32, #tpu.memory_space<vmem>>, vector<8x128xf32>,
    %c0_i32 = arith.constant 0 : i32
    %46 = arith.index_cast %c0_i32 : i32 to index
    %c0_39 = arith.constant 0 : index
    %47 = vector.load %arg9[%46, %c0_39] : memref<8x128xf32, #tpu.memory_space<vmem>>, vector<1x128xf32>
    %48 = arith.truncf %32 : vector<1x32xf32> to vector<1x32xbf16>
    %cst_40 = arith.constant dense<0.000000e+00> : vector<1x128xf32>
    %49 = tpu.matmul %48, %37, %cst_40 {dimension_numbers = #tpu.dot_dimension_numbers<[1], [0], [0], [1], [0, 0, 1, 1], [], []>} : vector<1x32xbf16>, vector<32x128xbf16>, vector<1x128xf32> -> vector<1x128xf32>
    %50 = arith.addf %47, %49 : vector<1x128xf32>
    %51 = arith.negf %50 : vector<1x128xf32>
    %52 = math.exp %51 : vector<1x128xf32>
    %cst_41 = arith.constant 1.000000e+00 : f32
    %53 = vector.broadcast %cst_41 : f32 to vector<1x128xf32>
    %54 = arith.addf %53, %52 : vector<1x128xf32>
    %55 = arith.divf %53, %54 : vector<1x128xf32>
    %56 = math.tanh %50 : vector<1x128xf32>
    %57 = vector.extract_strided_slice %55 {offsets = [0, 0], sizes = [1, 32], strides = [1, 1]} : vector<1x128xf32> to vector<1x32xf32>
    %58 = vector.extract_strided_slice %55 {offsets = [0, 32], sizes = [1, 32], strides = [1, 1]} : vector<1x128xf32> to vector<1x32xf32>
    %59 = vector.extract_strided_slice %56 {offsets = [0, 64], sizes = [1, 32], strides = [1, 1]} : vector<1x128xf32> to vector<1x32xf32>
    %60 = vector.extract_strided_slice %55 {offsets = [0, 96], sizes = [1, 32], strides = [1, 1]} : vector<1x128xf32> to vector<1x32xf32>
    %61 = arith.mulf %58, %33 : vector<1x32xf32>
    %62 = arith.mulf %57, %59 : vector<1x32xf32>
    %63 = arith.addf %61, %62 : vector<1x32xf32>
    %64 = math.tanh %63 : vector<1x32xf32>
    %65 = arith.mulf %60, %64 : vector<1x32xf32>
    %66 = arith.index_cast %c0_i32 : i32 to index
    %c0_42 = arith.constant 0 : index
    %67 = vector.load %arg8[%66, %c0_42] : memref<8x32xf32, #tpu.memory_space<vmem>>, vector<1x32xf32>
    tpu.vector_store %arg8[%66, %c0_42], %65 {strides = array<i32>} : memref<8x32xf32, #tpu.memory_space<vmem>>, vector<1x32xf32>,
    %c1_i32 = arith.constant 1 : i32
    %68 = arith.index_cast %c1_i32 : i32 to index
    %c0_43 = arith.constant 0 : index
    %69 = vector.load %arg9[%68, %c0_43] : memref<8x128xf32, #tpu.memory_space<vmem>>, vector<1x128xf32>
    %70 = arith.truncf %65 : vector<1x32xf32> to vector<1x32xbf16>
    %cst_44 = arith.constant dense<0.000000e+00> : vector<1x128xf32>
    %71 = tpu.matmul %70, %37, %cst_44 {dimension_numbers = #tpu.dot_dimension_numbers<[1], [0], [0], [1], [0, 0, 1, 1], [], []>} : vector<1x32xbf16>, vector<32x128xbf16>, vector<1x128xf32> -> vector<1x128xf32>
    %72 = arith.addf %69, %71 : vector<1x128xf32>
    %73 = arith.negf %72 : vector<1x128xf32>
    %74 = math.exp %73 : vector<1x128xf32>
    %cst_45 = arith.constant 1.000000e+00 : f32
    %75 = vector.broadcast %cst_45 : f32 to vector<1x128xf32>
    %76 = arith.addf %75, %74 : vector<1x128xf32>
    %77 = arith.divf %75, %76 : vector<1x128xf32>
    %78 = math.tanh %72 : vector<1x128xf32>
    %79 = vector.extract_strided_slice %77 {offsets = [0, 0], sizes = [1, 32], strides = [1, 1]} : vector<1x128xf32> to vector<1x32xf32>
    %80 = vector.extract_strided_slice %77 {offsets = [0, 32], sizes = [1, 32], strides = [1, 1]} : vector<1x128xf32> to vector<1x32xf32>
    %81 = vector.extract_strided_slice %78 {offsets = [0, 64], sizes = [1, 32], strides = [1, 1]} : vector<1x128xf32> to vector<1x32xf32>
    %82 = vector.extract_strided_slice %77 {offsets = [0, 96], sizes = [1, 32], strides = [1, 1]} : vector<1x128xf32> to vector<1x32xf32>
    %83 = arith.mulf %80, %63 : vector<1x32xf32>
    %84 = arith.mulf %79, %81 : vector<1x32xf32>
    %85 = arith.addf %83, %84 : vector<1x32xf32>
    %86 = math.tanh %85 : vector<1x32xf32>
    %87 = arith.mulf %82, %86 : vector<1x32xf32>
    %88 = arith.index_cast %c1_i32 : i32 to index
    %c0_46 = arith.constant 0 : index
    %89 = vector.load %arg8[%88, %c0_46] : memref<8x32xf32, #tpu.memory_space<vmem>>, vector<1x32xf32>
    tpu.vector_store %arg8[%88, %c0_46], %87 {strides = array<i32>} : memref<8x32xf32, #tpu.memory_space<vmem>>, vector<1x32xf32>,
    %c2_i32 = arith.constant 2 : i32
    %90 = arith.index_cast %c2_i32 : i32 to index
    %c0_47 = arith.constant 0 : index
    %91 = vector.load %arg9[%90, %c0_47] : memref<8x128xf32, #tpu.memory_space<vmem>>, vector<1x128xf32>
    %92 = arith.truncf %87 : vector<1x32xf32> to vector<1x32xbf16>
    %cst_48 = arith.constant dense<0.000000e+00> : vector<1x128xf32>
    %93 = tpu.matmul %92, %37, %cst_48 {dimension_numbers = #tpu.dot_dimension_numbers<[1], [0], [0], [1], [0, 0, 1, 1], [], []>} : vector<1x32xbf16>, vector<32x128xbf16>, vector<1x128xf32> -> vector<1x128xf32>
    %94 = arith.addf %91, %93 : vector<1x128xf32>
    %95 = arith.negf %94 : vector<1x128xf32>
    %96 = math.exp %95 : vector<1x128xf32>
    %cst_49 = arith.constant 1.000000e+00 : f32
    %97 = vector.broadcast %cst_49 : f32 to vector<1x128xf32>
    %98 = arith.addf %97, %96 : vector<1x128xf32>
    %99 = arith.divf %97, %98 : vector<1x128xf32>
    %100 = math.tanh %94 : vector<1x128xf32>
    %101 = vector.extract_strided_slice %99 {offsets = [0, 0], sizes = [1, 32], strides = [1, 1]} : vector<1x128xf32> to vector<1x32xf32>
    %102 = vector.extract_strided_slice %99 {offsets = [0, 32], sizes = [1, 32], strides = [1, 1]} : vector<1x128xf32> to vector<1x32xf32>
    %103 = vector.extract_strided_slice %100 {offsets = [0, 64], sizes = [1, 32], strides = [1, 1]} : vector<1x128xf32> to vector<1x32xf32>
    %104 = vector.extract_strided_slice %99 {offsets = [0, 96], sizes = [1, 32], strides = [1, 1]} : vector<1x128xf32> to vector<1x32xf32>
    %105 = arith.mulf %102, %85 : vector<1x32xf32>
    %106 = arith.mulf %101, %103 : vector<1x32xf32>
    %107 = arith.addf %105, %106 : vector<1x32xf32>
    %108 = math.tanh %107 : vector<1x32xf32>
    %109 = arith.mulf %104, %108 : vector<1x32xf32>
    %110 = arith.index_cast %c2_i32 : i32 to index
    %c0_50 = arith.constant 0 : index
    %111 = vector.load %arg8[%110, %c0_50] : memref<8x32xf32, #tpu.memory_space<vmem>>, vector<1x32xf32>
    tpu.vector_store %arg8[%110, %c0_50], %109 {strides = array<i32>} : memref<8x32xf32, #tpu.memory_space<vmem>>, vector<1x32xf32>,
    %c3_i32 = arith.constant 3 : i32
    %112 = arith.index_cast %c3_i32 : i32 to index
    %c0_51 = arith.constant 0 : index
    %113 = vector.load %arg9[%112, %c0_51] : memref<8x128xf32, #tpu.memory_space<vmem>>, vector<1x128xf32>
    %114 = arith.truncf %109 : vector<1x32xf32> to vector<1x32xbf16>
    %cst_52 = arith.constant dense<0.000000e+00> : vector<1x128xf32>
    %115 = tpu.matmul %114, %37, %cst_52 {dimension_numbers = #tpu.dot_dimension_numbers<[1], [0], [0], [1], [0, 0, 1, 1], [], []>} : vector<1x32xbf16>, vector<32x128xbf16>, vector<1x128xf32> -> vector<1x128xf32>
    %116 = arith.addf %113, %115 : vector<1x128xf32>
    %117 = arith.negf %116 : vector<1x128xf32>
    %118 = math.exp %117 : vector<1x128xf32>
    %cst_53 = arith.constant 1.000000e+00 : f32
    %119 = vector.broadcast %cst_53 : f32 to vector<1x128xf32>
    %120 = arith.addf %119, %118 : vector<1x128xf32>
    %121 = arith.divf %119, %120 : vector<1x128xf32>
    %122 = math.tanh %116 : vector<1x128xf32>
    %123 = vector.extract_strided_slice %121 {offsets = [0, 0], sizes = [1, 32], strides = [1, 1]} : vector<1x128xf32> to vector<1x32xf32>
    %124 = vector.extract_strided_slice %121 {offsets = [0, 32], sizes = [1, 32], strides = [1, 1]} : vector<1x128xf32> to vector<1x32xf32>
    %125 = vector.extract_strided_slice %122 {offsets = [0, 64], sizes = [1, 32], strides = [1, 1]} : vector<1x128xf32> to vector<1x32xf32>
    %126 = vector.extract_strided_slice %121 {offsets = [0, 96], sizes = [1, 32], strides = [1, 1]} : vector<1x128xf32> to vector<1x32xf32>
    %127 = arith.mulf %124, %107 : vector<1x32xf32>
    %128 = arith.mulf %123, %125 : vector<1x32xf32>
    %129 = arith.addf %127, %128 : vector<1x32xf32>
    %130 = math.tanh %129 : vector<1x32xf32>
    %131 = arith.mulf %126, %130 : vector<1x32xf32>
    %132 = arith.index_cast %c3_i32 : i32 to index
    %c0_54 = arith.constant 0 : index
    %133 = vector.load %arg8[%132, %c0_54] : memref<8x32xf32, #tpu.memory_space<vmem>>, vector<1x32xf32>
    tpu.vector_store %arg8[%132, %c0_54], %131 {strides = array<i32>} : memref<8x32xf32, #tpu.memory_space<vmem>>, vector<1x32xf32>,
    %c4_i32 = arith.constant 4 : i32
    %134 = arith.index_cast %c4_i32 : i32 to index
    %c0_55 = arith.constant 0 : index
    %135 = vector.load %arg9[%134, %c0_55] : memref<8x128xf32, #tpu.memory_space<vmem>>, vector<1x128xf32>
    %136 = arith.truncf %131 : vector<1x32xf32> to vector<1x32xbf16>
    %cst_56 = arith.constant dense<0.000000e+00> : vector<1x128xf32>
    %137 = tpu.matmul %136, %37, %cst_56 {dimension_numbers = #tpu.dot_dimension_numbers<[1], [0], [0], [1], [0, 0, 1, 1], [], []>} : vector<1x32xbf16>, vector<32x128xbf16>, vector<1x128xf32> -> vector<1x128xf32>
    %138 = arith.addf %135, %137 : vector<1x128xf32>
    %139 = arith.negf %138 : vector<1x128xf32>
    %140 = math.exp %139 : vector<1x128xf32>
    %cst_57 = arith.constant 1.000000e+00 : f32
    %141 = vector.broadcast %cst_57 : f32 to vector<1x128xf32>
    %142 = arith.addf %141, %140 : vector<1x128xf32>
    %143 = arith.divf %141, %142 : vector<1x128xf32>
    %144 = math.tanh %138 : vector<1x128xf32>
    %145 = vector.extract_strided_slice %143 {offsets = [0, 0], sizes = [1, 32], strides = [1, 1]} : vector<1x128xf32> to vector<1x32xf32>
    %146 = vector.extract_strided_slice %143 {offsets = [0, 32], sizes = [1, 32], strides = [1, 1]} : vector<1x128xf32> to vector<1x32xf32>
    %147 = vector.extract_strided_slice %144 {offsets = [0, 64], sizes = [1, 32], strides = [1, 1]} : vector<1x128xf32> to vector<1x32xf32>
    %148 = vector.extract_strided_slice %143 {offsets = [0, 96], sizes = [1, 32], strides = [1, 1]} : vector<1x128xf32> to vector<1x32xf32>
    %149 = arith.mulf %146, %129 : vector<1x32xf32>
    %150 = arith.mulf %145, %147 : vector<1x32xf32>
    %151 = arith.addf %149, %150 : vector<1x32xf32>
    %152 = math.tanh %151 : vector<1x32xf32>
    %153 = arith.mulf %148, %152 : vector<1x32xf32>
    %154 = arith.index_cast %c4_i32 : i32 to index
    %c0_58 = arith.constant 0 : index
    %155 = vector.load %arg8[%154, %c0_58] : memref<8x32xf32, #tpu.memory_space<vmem>>, vector<1x32xf32>
    tpu.vector_store %arg8[%154, %c0_58], %153 {strides = array<i32>} : memref<8x32xf32, #tpu.memory_space<vmem>>, vector<1x32xf32>,
    %c5_i32 = arith.constant 5 : i32
    %156 = arith.index_cast %c5_i32 : i32 to index
    %c0_59 = arith.constant 0 : index
    %157 = vector.load %arg9[%156, %c0_59] : memref<8x128xf32, #tpu.memory_space<vmem>>, vector<1x128xf32>
    %158 = arith.truncf %153 : vector<1x32xf32> to vector<1x32xbf16>
    %cst_60 = arith.constant dense<0.000000e+00> : vector<1x128xf32>
    %159 = tpu.matmul %158, %37, %cst_60 {dimension_numbers = #tpu.dot_dimension_numbers<[1], [0], [0], [1], [0, 0, 1, 1], [], []>} : vector<1x32xbf16>, vector<32x128xbf16>, vector<1x128xf32> -> vector<1x128xf32>
    %160 = arith.addf %157, %159 : vector<1x128xf32>
    %161 = arith.negf %160 : vector<1x128xf32>
    %162 = math.exp %161 : vector<1x128xf32>
    %cst_61 = arith.constant 1.000000e+00 : f32
    %163 = vector.broadcast %cst_61 : f32 to vector<1x128xf32>
    %164 = arith.addf %163, %162 : vector<1x128xf32>
    %165 = arith.divf %163, %164 : vector<1x128xf32>
    %166 = math.tanh %160 : vector<1x128xf32>
    %167 = vector.extract_strided_slice %165 {offsets = [0, 0], sizes = [1, 32], strides = [1, 1]} : vector<1x128xf32> to vector<1x32xf32>
    %168 = vector.extract_strided_slice %165 {offsets = [0, 32], sizes = [1, 32], strides = [1, 1]} : vector<1x128xf32> to vector<1x32xf32>
    %169 = vector.extract_strided_slice %166 {offsets = [0, 64], sizes = [1, 32], strides = [1, 1]} : vector<1x128xf32> to vector<1x32xf32>
    %170 = vector.extract_strided_slice %165 {offsets = [0, 96], sizes = [1, 32], strides = [1, 1]} : vector<1x128xf32> to vector<1x32xf32>
    %171 = arith.mulf %168, %151 : vector<1x32xf32>
    %172 = arith.mulf %167, %169 : vector<1x32xf32>
    %173 = arith.addf %171, %172 : vector<1x32xf32>
    %174 = math.tanh %173 : vector<1x32xf32>
    %175 = arith.mulf %170, %174 : vector<1x32xf32>
    %176 = arith.index_cast %c5_i32 : i32 to index
    %c0_62 = arith.constant 0 : index
    %177 = vector.load %arg8[%176, %c0_62] : memref<8x32xf32, #tpu.memory_space<vmem>>, vector<1x32xf32>
    tpu.vector_store %arg8[%176, %c0_62], %175 {strides = array<i32>} : memref<8x32xf32, #tpu.memory_space<vmem>>, vector<1x32xf32>,
    %c6_i32 = arith.constant 6 : i32
    %178 = arith.index_cast %c6_i32 : i32 to index
    %c0_63 = arith.constant 0 : index
    %179 = vector.load %arg9[%178, %c0_63] : memref<8x128xf32, #tpu.memory_space<vmem>>, vector<1x128xf32>
    %180 = arith.truncf %175 : vector<1x32xf32> to vector<1x32xbf16>
    %cst_64 = arith.constant dense<0.000000e+00> : vector<1x128xf32>
    %181 = tpu.matmul %180, %37, %cst_64 {dimension_numbers = #tpu.dot_dimension_numbers<[1], [0], [0], [1], [0, 0, 1, 1], [], []>} : vector<1x32xbf16>, vector<32x128xbf16>, vector<1x128xf32> -> vector<1x128xf32>
    %182 = arith.addf %179, %181 : vector<1x128xf32>
    %183 = arith.negf %182 : vector<1x128xf32>
    %184 = math.exp %183 : vector<1x128xf32>
    %cst_65 = arith.constant 1.000000e+00 : f32
    %185 = vector.broadcast %cst_65 : f32 to vector<1x128xf32>
    %186 = arith.addf %185, %184 : vector<1x128xf32>
    %187 = arith.divf %185, %186 : vector<1x128xf32>
    %188 = math.tanh %182 : vector<1x128xf32>
    %189 = vector.extract_strided_slice %187 {offsets = [0, 0], sizes = [1, 32], strides = [1, 1]} : vector<1x128xf32> to vector<1x32xf32>
    %190 = vector.extract_strided_slice %187 {offsets = [0, 32], sizes = [1, 32], strides = [1, 1]} : vector<1x128xf32> to vector<1x32xf32>
    %191 = vector.extract_strided_slice %188 {offsets = [0, 64], sizes = [1, 32], strides = [1, 1]} : vector<1x128xf32> to vector<1x32xf32>
    %192 = vector.extract_strided_slice %187 {offsets = [0, 96], sizes = [1, 32], strides = [1, 1]} : vector<1x128xf32> to vector<1x32xf32>
    %193 = arith.mulf %190, %173 : vector<1x32xf32>
    %194 = arith.mulf %189, %191 : vector<1x32xf32>
    %195 = arith.addf %193, %194 : vector<1x32xf32>
    %196 = math.tanh %195 : vector<1x32xf32>
    %197 = arith.mulf %192, %196 : vector<1x32xf32>
    %198 = arith.index_cast %c6_i32 : i32 to index
    %c0_66 = arith.constant 0 : index
    %199 = vector.load %arg8[%198, %c0_66] : memref<8x32xf32, #tpu.memory_space<vmem>>, vector<1x32xf32>
    tpu.vector_store %arg8[%198, %c0_66], %197 {strides = array<i32>} : memref<8x32xf32, #tpu.memory_space<vmem>>, vector<1x32xf32>,
    %c7_i32 = arith.constant 7 : i32
    %200 = arith.index_cast %c7_i32 : i32 to index
    %c0_67 = arith.constant 0 : index
    %201 = vector.load %arg9[%200, %c0_67] : memref<8x128xf32, #tpu.memory_space<vmem>>, vector<1x128xf32>
    %202 = arith.truncf %197 : vector<1x32xf32> to vector<1x32xbf16>
    %cst_68 = arith.constant dense<0.000000e+00> : vector<1x128xf32>
    %203 = tpu.matmul %202, %37, %cst_68 {dimension_numbers = #tpu.dot_dimension_numbers<[1], [0], [0], [1], [0, 0, 1, 1], [], []>} : vector<1x32xbf16>, vector<32x128xbf16>, vector<1x128xf32> -> vector<1x128xf32>
    %204 = arith.addf %201, %203 : vector<1x128xf32>
    %205 = arith.negf %204 : vector<1x128xf32>
    %206 = math.exp %205 : vector<1x128xf32>
    %cst_69 = arith.constant 1.000000e+00 : f32
    %207 = vector.broadcast %cst_69 : f32 to vector<1x128xf32>
    %208 = arith.addf %207, %206 : vector<1x128xf32>
    %209 = arith.divf %207, %208 : vector<1x128xf32>
    %210 = math.tanh %204 : vector<1x128xf32>
    %211 = vector.extract_strided_slice %209 {offsets = [0, 0], sizes = [1, 32], strides = [1, 1]} : vector<1x128xf32> to vector<1x32xf32>
    %212 = vector.extract_strided_slice %209 {offsets = [0, 32], sizes = [1, 32], strides = [1, 1]} : vector<1x128xf32> to vector<1x32xf32>
    %213 = vector.extract_strided_slice %210 {offsets = [0, 64], sizes = [1, 32], strides = [1, 1]} : vector<1x128xf32> to vector<1x32xf32>
    %214 = vector.extract_strided_slice %209 {offsets = [0, 96], sizes = [1, 32], strides = [1, 1]} : vector<1x128xf32> to vector<1x32xf32>
    %215 = arith.mulf %212, %195 : vector<1x32xf32>
    %216 = arith.mulf %211, %213 : vector<1x32xf32>
    %217 = arith.addf %215, %216 : vector<1x32xf32>
    %218 = math.tanh %217 : vector<1x32xf32>
    %219 = arith.mulf %214, %218 : vector<1x32xf32>
    %220 = arith.index_cast %c7_i32 : i32 to index
    %c0_70 = arith.constant 0 : index
    %221 = vector.load %arg8[%220, %c0_70] : memref<8x32xf32, #tpu.memory_space<vmem>>, vector<1x32xf32>
    tpu.vector_store %arg8[%220, %c0_70], %219 {strides = array<i32>} : memref<8x32xf32, #tpu.memory_space<vmem>>, vector<1x32xf32>,
    %c8_i32 = arith.constant 8 : i32
    %c1_71 = arith.constant 1 : index
    %c0_72 = arith.constant 0 : index
    %c0_73 = arith.constant 0 : index
    %222 = vector.load %arg2[%c1_71, %c0_72, %c0_73] : memref<2x32x128xbf16, #tpu.memory_space<vmem>>, vector<1x32x128xbf16>
    %223 = vector.shape_cast %222 : vector<1x32x128xbf16> to vector<32x128xbf16>
    %c1_74 = arith.constant 1 : index
    %c0_75 = arith.constant 0 : index
    %c0_76 = arith.constant 0 : index
    %224 = vector.load %arg3[%c1_74, %c0_75, %c0_76] : memref<2x32x128xbf16, #tpu.memory_space<vmem>>, vector<1x32x128xbf16>
    %225 = vector.shape_cast %224 : vector<1x32x128xbf16> to vector<32x128xbf16>
    %c1_77 = arith.constant 1 : index
    %c0_78 = arith.constant 0 : index
    %c0_79 = arith.constant 0 : index
    %226 = vector.load %arg4[%c1_77, %c0_78, %c0_79] : memref<2x1x128xf32, #tpu.memory_space<vmem>>, vector<1x1x128xf32>
    %227 = vector.shape_cast %226 : vector<1x1x128xf32> to vector<1x128xf32>
    %c0_80 = arith.constant 0 : index
    %c0_81 = arith.constant 0 : index
    %228 = vector.load %arg8[%c0_80, %c0_81] : memref<8x32xf32, #tpu.memory_space<vmem>>, vector<8x32xf32>
    %229 = arith.truncf %228 : vector<8x32xf32> to vector<8x32xbf16>
    %cst_82 = arith.constant dense<0.000000e+00> : vector<8x128xf32>
    %230 = tpu.matmul %229, %223, %cst_82 {dimension_numbers = #tpu.dot_dimension_numbers<[1], [0], [0], [1], [0, 0, 1, 1], [], []>} : vector<8x32xbf16>, vector<32x128xbf16>, vector<8x128xf32> -> vector<8x128xf32>
    %231 = vector.broadcast %227 : vector<1x128xf32> to vector<8x128xf32>
    %232 = arith.addf %230, %231 : vector<8x128xf32>
    %c0_83 = arith.constant 0 : index
    %c0_84 = arith.constant 0 : index
    %233 = vector.load %arg9[%c0_83, %c0_84] : memref<8x128xf32, #tpu.memory_space<vmem>>, vector<8x128xf32>
    tpu.vector_store %arg9[%c0_83, %c0_84], %232 {strides = array<i32>} : memref<8x128xf32, #tpu.memory_space<vmem>>, vector<8x128xf32>,
    %c0_i32_85 = arith.constant 0 : i32
    %234 = arith.index_cast %c0_i32_85 : i32 to index
    %c0_86 = arith.constant 0 : index
    %235 = vector.load %arg9[%234, %c0_86] : memref<8x128xf32, #tpu.memory_space<vmem>>, vector<1x128xf32>
    %236 = arith.truncf %32 : vector<1x32xf32> to vector<1x32xbf16>
    %cst_87 = arith.constant dense<0.000000e+00> : vector<1x128xf32>
    %237 = tpu.matmul %236, %225, %cst_87 {dimension_numbers = #tpu.dot_dimension_numbers<[1], [0], [0], [1], [0, 0, 1, 1], [], []>} : vector<1x32xbf16>, vector<32x128xbf16>, vector<1x128xf32> -> vector<1x128xf32>
    %238 = arith.addf %235, %237 : vector<1x128xf32>
    %239 = arith.negf %238 : vector<1x128xf32>
    %240 = math.exp %239 : vector<1x128xf32>
    %cst_88 = arith.constant 1.000000e+00 : f32
    %241 = vector.broadcast %cst_88 : f32 to vector<1x128xf32>
    %242 = arith.addf %241, %240 : vector<1x128xf32>
    %243 = arith.divf %241, %242 : vector<1x128xf32>
    %244 = math.tanh %238 : vector<1x128xf32>
    %245 = vector.extract_strided_slice %243 {offsets = [0, 0], sizes = [1, 32], strides = [1, 1]} : vector<1x128xf32> to vector<1x32xf32>
    %246 = vector.extract_strided_slice %243 {offsets = [0, 32], sizes = [1, 32], strides = [1, 1]} : vector<1x128xf32> to vector<1x32xf32>
    %247 = vector.extract_strided_slice %244 {offsets = [0, 64], sizes = [1, 32], strides = [1, 1]} : vector<1x128xf32> to vector<1x32xf32>
    %248 = vector.extract_strided_slice %243 {offsets = [0, 96], sizes = [1, 32], strides = [1, 1]} : vector<1x128xf32> to vector<1x32xf32>
    %249 = arith.mulf %246, %33 : vector<1x32xf32>
    %250 = arith.mulf %245, %247 : vector<1x32xf32>
    %251 = arith.addf %249, %250 : vector<1x32xf32>
    %252 = math.tanh %251 : vector<1x32xf32>
    %253 = arith.mulf %248, %252 : vector<1x32xf32>
    %254 = arith.index_cast %c0_i32_85 : i32 to index
    %c0_89 = arith.constant 0 : index
    %255 = vector.load %arg8[%254, %c0_89] : memref<8x32xf32, #tpu.memory_space<vmem>>, vector<1x32xf32>
    tpu.vector_store %arg8[%254, %c0_89], %253 {strides = array<i32>} : memref<8x32xf32, #tpu.memory_space<vmem>>, vector<1x32xf32>,
    %c1_i32_90 = arith.constant 1 : i32
    %256 = arith.index_cast %c1_i32_90 : i32 to index
    %c0_91 = arith.constant 0 : index
    %257 = vector.load %arg9[%256, %c0_91] : memref<8x128xf32, #tpu.memory_space<vmem>>, vector<1x128xf32>
    %258 = arith.truncf %253 : vector<1x32xf32> to vector<1x32xbf16>
    %cst_92 = arith.constant dense<0.000000e+00> : vector<1x128xf32>
    %259 = tpu.matmul %258, %225, %cst_92 {dimension_numbers = #tpu.dot_dimension_numbers<[1], [0], [0], [1], [0, 0, 1, 1], [], []>} : vector<1x32xbf16>, vector<32x128xbf16>, vector<1x128xf32> -> vector<1x128xf32>
    %260 = arith.addf %257, %259 : vector<1x128xf32>
    %261 = arith.negf %260 : vector<1x128xf32>
    %262 = math.exp %261 : vector<1x128xf32>
    %cst_93 = arith.constant 1.000000e+00 : f32
    %263 = vector.broadcast %cst_93 : f32 to vector<1x128xf32>
    %264 = arith.addf %263, %262 : vector<1x128xf32>
    %265 = arith.divf %263, %264 : vector<1x128xf32>
    %266 = math.tanh %260 : vector<1x128xf32>
    %267 = vector.extract_strided_slice %265 {offsets = [0, 0], sizes = [1, 32], strides = [1, 1]} : vector<1x128xf32> to vector<1x32xf32>
    %268 = vector.extract_strided_slice %265 {offsets = [0, 32], sizes = [1, 32], strides = [1, 1]} : vector<1x128xf32> to vector<1x32xf32>
    %269 = vector.extract_strided_slice %266 {offsets = [0, 64], sizes = [1, 32], strides = [1, 1]} : vector<1x128xf32> to vector<1x32xf32>
    %270 = vector.extract_strided_slice %265 {offsets = [0, 96], sizes = [1, 32], strides = [1, 1]} : vector<1x128xf32> to vector<1x32xf32>
    %271 = arith.mulf %268, %251 : vector<1x32xf32>
    %272 = arith.mulf %267, %269 : vector<1x32xf32>
    %273 = arith.addf %271, %272 : vector<1x32xf32>
    %274 = math.tanh %273 : vector<1x32xf32>
    %275 = arith.mulf %270, %274 : vector<1x32xf32>
    %276 = arith.index_cast %c1_i32_90 : i32 to index
    %c0_94 = arith.constant 0 : index
    %277 = vector.load %arg8[%276, %c0_94] : memref<8x32xf32, #tpu.memory_space<vmem>>, vector<1x32xf32>
    tpu.vector_store %arg8[%276, %c0_94], %275 {strides = array<i32>} : memref<8x32xf32, #tpu.memory_space<vmem>>, vector<1x32xf32>,
    %c2_i32_95 = arith.constant 2 : i32
    %278 = arith.index_cast %c2_i32_95 : i32 to index
    %c0_96 = arith.constant 0 : index
    %279 = vector.load %arg9[%278, %c0_96] : memref<8x128xf32, #tpu.memory_space<vmem>>, vector<1x128xf32>
    %280 = arith.truncf %275 : vector<1x32xf32> to vector<1x32xbf16>
    %cst_97 = arith.constant dense<0.000000e+00> : vector<1x128xf32>
    %281 = tpu.matmul %280, %225, %cst_97 {dimension_numbers = #tpu.dot_dimension_numbers<[1], [0], [0], [1], [0, 0, 1, 1], [], []>} : vector<1x32xbf16>, vector<32x128xbf16>, vector<1x128xf32> -> vector<1x128xf32>
    %282 = arith.addf %279, %281 : vector<1x128xf32>
    %283 = arith.negf %282 : vector<1x128xf32>
    %284 = math.exp %283 : vector<1x128xf32>
    %cst_98 = arith.constant 1.000000e+00 : f32
    %285 = vector.broadcast %cst_98 : f32 to vector<1x128xf32>
    %286 = arith.addf %285, %284 : vector<1x128xf32>
    %287 = arith.divf %285, %286 : vector<1x128xf32>
    %288 = math.tanh %282 : vector<1x128xf32>
    %289 = vector.extract_strided_slice %287 {offsets = [0, 0], sizes = [1, 32], strides = [1, 1]} : vector<1x128xf32> to vector<1x32xf32>
    %290 = vector.extract_strided_slice %287 {offsets = [0, 32], sizes = [1, 32], strides = [1, 1]} : vector<1x128xf32> to vector<1x32xf32>
    %291 = vector.extract_strided_slice %288 {offsets = [0, 64], sizes = [1, 32], strides = [1, 1]} : vector<1x128xf32> to vector<1x32xf32>
    %292 = vector.extract_strided_slice %287 {offsets = [0, 96], sizes = [1, 32], strides = [1, 1]} : vector<1x128xf32> to vector<1x32xf32>
    %293 = arith.mulf %290, %273 : vector<1x32xf32>
    %294 = arith.mulf %289, %291 : vector<1x32xf32>
    %295 = arith.addf %293, %294 : vector<1x32xf32>
    %296 = math.tanh %295 : vector<1x32xf32>
    %297 = arith.mulf %292, %296 : vector<1x32xf32>
    %298 = arith.index_cast %c2_i32_95 : i32 to index
    %c0_99 = arith.constant 0 : index
    %299 = vector.load %arg8[%298, %c0_99] : memref<8x32xf32, #tpu.memory_space<vmem>>, vector<1x32xf32>
    tpu.vector_store %arg8[%298, %c0_99], %297 {strides = array<i32>} : memref<8x32xf32, #tpu.memory_space<vmem>>, vector<1x32xf32>,
    %c3_i32_100 = arith.constant 3 : i32
    %300 = arith.index_cast %c3_i32_100 : i32 to index
    %c0_101 = arith.constant 0 : index
    %301 = vector.load %arg9[%300, %c0_101] : memref<8x128xf32, #tpu.memory_space<vmem>>, vector<1x128xf32>
    %302 = arith.truncf %297 : vector<1x32xf32> to vector<1x32xbf16>
    %cst_102 = arith.constant dense<0.000000e+00> : vector<1x128xf32>
    %303 = tpu.matmul %302, %225, %cst_102 {dimension_numbers = #tpu.dot_dimension_numbers<[1], [0], [0], [1], [0, 0, 1, 1], [], []>} : vector<1x32xbf16>, vector<32x128xbf16>, vector<1x128xf32> -> vector<1x128xf32>
    %304 = arith.addf %301, %303 : vector<1x128xf32>
    %305 = arith.negf %304 : vector<1x128xf32>
    %306 = math.exp %305 : vector<1x128xf32>
    %cst_103 = arith.constant 1.000000e+00 : f32
    %307 = vector.broadcast %cst_103 : f32 to vector<1x128xf32>
    %308 = arith.addf %307, %306 : vector<1x128xf32>
    %309 = arith.divf %307, %308 : vector<1x128xf32>
    %310 = math.tanh %304 : vector<1x128xf32>
    %311 = vector.extract_strided_slice %309 {offsets = [0, 0], sizes = [1, 32], strides = [1, 1]} : vector<1x128xf32> to vector<1x32xf32>
    %312 = vector.extract_strided_slice %309 {offsets = [0, 32], sizes = [1, 32], strides = [1, 1]} : vector<1x128xf32> to vector<1x32xf32>
    %313 = vector.extract_strided_slice %310 {offsets = [0, 64], sizes = [1, 32], strides = [1, 1]} : vector<1x128xf32> to vector<1x32xf32>
    %314 = vector.extract_strided_slice %309 {offsets = [0, 96], sizes = [1, 32], strides = [1, 1]} : vector<1x128xf32> to vector<1x32xf32>
    %315 = arith.mulf %312, %295 : vector<1x32xf32>
    %316 = arith.mulf %311, %313 : vector<1x32xf32>
    %317 = arith.addf %315, %316 : vector<1x32xf32>
    %318 = math.tanh %317 : vector<1x32xf32>
    %319 = arith.mulf %314, %318 : vector<1x32xf32>
    %320 = arith.index_cast %c3_i32_100 : i32 to index
    %c0_104 = arith.constant 0 : index
    %321 = vector.load %arg8[%320, %c0_104] : memref<8x32xf32, #tpu.memory_space<vmem>>, vector<1x32xf32>
    tpu.vector_store %arg8[%320, %c0_104], %319 {strides = array<i32>} : memref<8x32xf32, #tpu.memory_space<vmem>>, vector<1x32xf32>,
    %c4_i32_105 = arith.constant 4 : i32
    %322 = arith.index_cast %c4_i32_105 : i32 to index
    %c0_106 = arith.constant 0 : index
    %323 = vector.load %arg9[%322, %c0_106] : memref<8x128xf32, #tpu.memory_space<vmem>>, vector<1x128xf32>
    %324 = arith.truncf %319 : vector<1x32xf32> to vector<1x32xbf16>
    %cst_107 = arith.constant dense<0.000000e+00> : vector<1x128xf32>
    %325 = tpu.matmul %324, %225, %cst_107 {dimension_numbers = #tpu.dot_dimension_numbers<[1], [0], [0], [1], [0, 0, 1, 1], [], []>} : vector<1x32xbf16>, vector<32x128xbf16>, vector<1x128xf32> -> vector<1x128xf32>
    %326 = arith.addf %323, %325 : vector<1x128xf32>
    %327 = arith.negf %326 : vector<1x128xf32>
    %328 = math.exp %327 : vector<1x128xf32>
    %cst_108 = arith.constant 1.000000e+00 : f32
    %329 = vector.broadcast %cst_108 : f32 to vector<1x128xf32>
    %330 = arith.addf %329, %328 : vector<1x128xf32>
    %331 = arith.divf %329, %330 : vector<1x128xf32>
    %332 = math.tanh %326 : vector<1x128xf32>
    %333 = vector.extract_strided_slice %331 {offsets = [0, 0], sizes = [1, 32], strides = [1, 1]} : vector<1x128xf32> to vector<1x32xf32>
    %334 = vector.extract_strided_slice %331 {offsets = [0, 32], sizes = [1, 32], strides = [1, 1]} : vector<1x128xf32> to vector<1x32xf32>
    %335 = vector.extract_strided_slice %332 {offsets = [0, 64], sizes = [1, 32], strides = [1, 1]} : vector<1x128xf32> to vector<1x32xf32>
    %336 = vector.extract_strided_slice %331 {offsets = [0, 96], sizes = [1, 32], strides = [1, 1]} : vector<1x128xf32> to vector<1x32xf32>
    %337 = arith.mulf %334, %317 : vector<1x32xf32>
    %338 = arith.mulf %333, %335 : vector<1x32xf32>
    %339 = arith.addf %337, %338 : vector<1x32xf32>
    %340 = math.tanh %339 : vector<1x32xf32>
    %341 = arith.mulf %336, %340 : vector<1x32xf32>
    %342 = arith.index_cast %c4_i32_105 : i32 to index
    %c0_109 = arith.constant 0 : index
    %343 = vector.load %arg8[%342, %c0_109] : memref<8x32xf32, #tpu.memory_space<vmem>>, vector<1x32xf32>
    tpu.vector_store %arg8[%342, %c0_109], %341 {strides = array<i32>} : memref<8x32xf32, #tpu.memory_space<vmem>>, vector<1x32xf32>,
    %c5_i32_110 = arith.constant 5 : i32
    %344 = arith.index_cast %c5_i32_110 : i32 to index
    %c0_111 = arith.constant 0 : index
    %345 = vector.load %arg9[%344, %c0_111] : memref<8x128xf32, #tpu.memory_space<vmem>>, vector<1x128xf32>
    %346 = arith.truncf %341 : vector<1x32xf32> to vector<1x32xbf16>
    %cst_112 = arith.constant dense<0.000000e+00> : vector<1x128xf32>
    %347 = tpu.matmul %346, %225, %cst_112 {dimension_numbers = #tpu.dot_dimension_numbers<[1], [0], [0], [1], [0, 0, 1, 1], [], []>} : vector<1x32xbf16>, vector<32x128xbf16>, vector<1x128xf32> -> vector<1x128xf32>
    %348 = arith.addf %345, %347 : vector<1x128xf32>
    %349 = arith.negf %348 : vector<1x128xf32>
    %350 = math.exp %349 : vector<1x128xf32>
    %cst_113 = arith.constant 1.000000e+00 : f32
    %351 = vector.broadcast %cst_113 : f32 to vector<1x128xf32>
    %352 = arith.addf %351, %350 : vector<1x128xf32>
    %353 = arith.divf %351, %352 : vector<1x128xf32>
    %354 = math.tanh %348 : vector<1x128xf32>
    %355 = vector.extract_strided_slice %353 {offsets = [0, 0], sizes = [1, 32], strides = [1, 1]} : vector<1x128xf32> to vector<1x32xf32>
    %356 = vector.extract_strided_slice %353 {offsets = [0, 32], sizes = [1, 32], strides = [1, 1]} : vector<1x128xf32> to vector<1x32xf32>
    %357 = vector.extract_strided_slice %354 {offsets = [0, 64], sizes = [1, 32], strides = [1, 1]} : vector<1x128xf32> to vector<1x32xf32>
    %358 = vector.extract_strided_slice %353 {offsets = [0, 96], sizes = [1, 32], strides = [1, 1]} : vector<1x128xf32> to vector<1x32xf32>
    %359 = arith.mulf %356, %339 : vector<1x32xf32>
    %360 = arith.mulf %355, %357 : vector<1x32xf32>
    %361 = arith.addf %359, %360 : vector<1x32xf32>
    %362 = math.tanh %361 : vector<1x32xf32>
    %363 = arith.mulf %358, %362 : vector<1x32xf32>
    %364 = arith.index_cast %c5_i32_110 : i32 to index
    %c0_114 = arith.constant 0 : index
    %365 = vector.load %arg8[%364, %c0_114] : memref<8x32xf32, #tpu.memory_space<vmem>>, vector<1x32xf32>
    tpu.vector_store %arg8[%364, %c0_114], %363 {strides = array<i32>} : memref<8x32xf32, #tpu.memory_space<vmem>>, vector<1x32xf32>,
    %c6_i32_115 = arith.constant 6 : i32
    %366 = arith.index_cast %c6_i32_115 : i32 to index
    %c0_116 = arith.constant 0 : index
    %367 = vector.load %arg9[%366, %c0_116] : memref<8x128xf32, #tpu.memory_space<vmem>>, vector<1x128xf32>
    %368 = arith.truncf %363 : vector<1x32xf32> to vector<1x32xbf16>
    %cst_117 = arith.constant dense<0.000000e+00> : vector<1x128xf32>
    %369 = tpu.matmul %368, %225, %cst_117 {dimension_numbers = #tpu.dot_dimension_numbers<[1], [0], [0], [1], [0, 0, 1, 1], [], []>} : vector<1x32xbf16>, vector<32x128xbf16>, vector<1x128xf32> -> vector<1x128xf32>
    %370 = arith.addf %367, %369 : vector<1x128xf32>
    %371 = arith.negf %370 : vector<1x128xf32>
    %372 = math.exp %371 : vector<1x128xf32>
    %cst_118 = arith.constant 1.000000e+00 : f32
    %373 = vector.broadcast %cst_118 : f32 to vector<1x128xf32>
    %374 = arith.addf %373, %372 : vector<1x128xf32>
    %375 = arith.divf %373, %374 : vector<1x128xf32>
    %376 = math.tanh %370 : vector<1x128xf32>
    %377 = vector.extract_strided_slice %375 {offsets = [0, 0], sizes = [1, 32], strides = [1, 1]} : vector<1x128xf32> to vector<1x32xf32>
    %378 = vector.extract_strided_slice %375 {offsets = [0, 32], sizes = [1, 32], strides = [1, 1]} : vector<1x128xf32> to vector<1x32xf32>
    %379 = vector.extract_strided_slice %376 {offsets = [0, 64], sizes = [1, 32], strides = [1, 1]} : vector<1x128xf32> to vector<1x32xf32>
    %380 = vector.extract_strided_slice %375 {offsets = [0, 96], sizes = [1, 32], strides = [1, 1]} : vector<1x128xf32> to vector<1x32xf32>
    %381 = arith.mulf %378, %361 : vector<1x32xf32>
    %382 = arith.mulf %377, %379 : vector<1x32xf32>
    %383 = arith.addf %381, %382 : vector<1x32xf32>
    %384 = math.tanh %383 : vector<1x32xf32>
    %385 = arith.mulf %380, %384 : vector<1x32xf32>
    %386 = arith.index_cast %c6_i32_115 : i32 to index
    %c0_119 = arith.constant 0 : index
    %387 = vector.load %arg8[%386, %c0_119] : memref<8x32xf32, #tpu.memory_space<vmem>>, vector<1x32xf32>
    tpu.vector_store %arg8[%386, %c0_119], %385 {strides = array<i32>} : memref<8x32xf32, #tpu.memory_space<vmem>>, vector<1x32xf32>,
    %c7_i32_120 = arith.constant 7 : i32
    %388 = arith.index_cast %c7_i32_120 : i32 to index
    %c0_121 = arith.constant 0 : index
    %389 = vector.load %arg9[%388, %c0_121] : memref<8x128xf32, #tpu.memory_space<vmem>>, vector<1x128xf32>
    %390 = arith.truncf %385 : vector<1x32xf32> to vector<1x32xbf16>
    %cst_122 = arith.constant dense<0.000000e+00> : vector<1x128xf32>
    %391 = tpu.matmul %390, %225, %cst_122 {dimension_numbers = #tpu.dot_dimension_numbers<[1], [0], [0], [1], [0, 0, 1, 1], [], []>} : vector<1x32xbf16>, vector<32x128xbf16>, vector<1x128xf32> -> vector<1x128xf32>
    %392 = arith.addf %389, %391 : vector<1x128xf32>
    %393 = arith.negf %392 : vector<1x128xf32>
    %394 = math.exp %393 : vector<1x128xf32>
    %cst_123 = arith.constant 1.000000e+00 : f32
    %395 = vector.broadcast %cst_123 : f32 to vector<1x128xf32>
    %396 = arith.addf %395, %394 : vector<1x128xf32>
    %397 = arith.divf %395, %396 : vector<1x128xf32>
    %398 = math.tanh %392 : vector<1x128xf32>
    %399 = vector.extract_strided_slice %397 {offsets = [0, 0], sizes = [1, 32], strides = [1, 1]} : vector<1x128xf32> to vector<1x32xf32>
    %400 = vector.extract_strided_slice %397 {offsets = [0, 32], sizes = [1, 32], strides = [1, 1]} : vector<1x128xf32> to vector<1x32xf32>
    %401 = vector.extract_strided_slice %398 {offsets = [0, 64], sizes = [1, 32], strides = [1, 1]} : vector<1x128xf32> to vector<1x32xf32>
    %402 = vector.extract_strided_slice %397 {offsets = [0, 96], sizes = [1, 32], strides = [1, 1]} : vector<1x128xf32> to vector<1x32xf32>
    %403 = arith.mulf %400, %383 : vector<1x32xf32>
    %404 = arith.mulf %399, %401 : vector<1x32xf32>
    %405 = arith.addf %403, %404 : vector<1x32xf32>
    %406 = math.tanh %405 : vector<1x32xf32>
    %407 = arith.mulf %402, %406 : vector<1x32xf32>
    %408 = arith.index_cast %c7_i32_120 : i32 to index
    %c0_124 = arith.constant 0 : index
    %409 = vector.load %arg8[%408, %c0_124] : memref<8x32xf32, #tpu.memory_space<vmem>>, vector<1x32xf32>
    tpu.vector_store %arg8[%408, %c0_124], %407 {strides = array<i32>} : memref<8x32xf32, #tpu.memory_space<vmem>>, vector<1x32xf32>,
    %c8_i32_125 = arith.constant 8 : i32
    %c0_126 = arith.constant 0 : index
    %c0_127 = arith.constant 0 : index
    %410 = vector.load %arg8[%c0_126, %c0_127] : memref<8x32xf32, #tpu.memory_space<vmem>>, vector<8x32xf32>
    %411 = arith.truncf %410 : vector<8x32xf32> to vector<8x32xbf16>
    %c0_128 = arith.constant 0 : index
    %c0_129 = arith.constant 0 : index
    %412 = vector.load %arg5[%c0_128, %c0_129] : memref<32x8xbf16, #tpu.memory_space<vmem>>, vector<32x8xbf16>
    %cst_130 = arith.constant dense<0.000000e+00> : vector<8x8xf32>
    %413 = tpu.matmul %411, %412, %cst_130 {dimension_numbers = #tpu.dot_dimension_numbers<[1], [0], [0], [1], [0, 0, 1, 1], [], []>} : vector<8x32xbf16>, vector<32x8xbf16>, vector<8x8xf32> -> vector<8x8xf32>
    %c0_131 = arith.constant 0 : index
    %c0_132 = arith.constant 0 : index
    %414 = vector.load %arg6[%c0_131, %c0_132] : memref<1x8xf32, #tpu.memory_space<vmem>>, vector<1x8xf32>
    %415 = vector.broadcast %414 : vector<1x8xf32> to vector<8x8xf32>
    %416 = arith.addf %413, %415 : vector<8x8xf32>
    %cst_133 = arith.constant dense<0xFF800000> : vector<8xf32>
    %417 = vector.multi_reduction <maximumf>, %416, %cst_133 [1] : vector<8x8xf32> to vector<8xf32>
    %418 = vector.shape_cast %417 : vector<8xf32> to vector<8x1xf32>
    %419 = vector.broadcast %418 : vector<8x1xf32> to vector<8x8xf32>
    %420 = arith.subf %416, %419 : vector<8x8xf32>
    %421 = math.exp %420 : vector<8x8xf32>
    %cst_134 = arith.constant dense<0.000000e+00> : vector<8xf32>
    %422 = vector.multi_reduction <add>, %421, %cst_134 [1] : vector<8x8xf32> to vector<8xf32>
    %423 = vector.shape_cast %422 : vector<8xf32> to vector<8x1xf32>
    %424 = math.log %423 : vector<8x1xf32>
    %425 = vector.broadcast %424 : vector<8x1xf32> to vector<8x8xf32>
    %426 = arith.subf %420, %425 : vector<8x8xf32>
    %c0_135 = arith.constant 0 : index
    %c0_136 = arith.constant 0 : index
    %427 = vector.load %arg7[%c0_135, %c0_136] : memref<8x8xf32, #tpu.memory_space<vmem>>, vector<8x8xf32>
    tpu.vector_store %arg7[%c0_135, %c0_136], %426 {strides = array<i32>} : memref<8x8xf32, #tpu.memory_space<vmem>>, vector<8x8xf32>,
    return
  }
}

</mosaic_0001>

<bundles_post_ra>
// kernel: tpu_custom_call.1
= control target key start
LH: loop header
LB: loop body
LE: loop exit
PB: predicated region body
PF: predicated region fallthrough
CT: control target
= control target key end

     0   :  { %12 = vsyncpa [#allocation6], 0  ;;  %s2479_s0 = inlined_call_operand.vmem [shape: s32[8], index: 0, kind: input, shape index: {}]   ;;  %s2480_s1 = inlined_call_operand.vmem [shape: f32[50,32], index: 1, kind: input, shape index: {}]   ;;  %s2481_s2 = inlined_call_operand.vmem [shape: bf16[2,32,128], index: 2, kind: input, shape index: {}]   ;;  %s2482_s3 = inlined_call_operand.vmem [shape: bf16[2,32,128], index: 3, kind: input, shape index: {}]   ;;  %s2483_s4 = inlined_call_operand.vmem [shape: f32[2,1,128], index: 4, kind: input, shape index: {}]   ;;  %s2484_s5 = inlined_call_operand.vmem [shape: bf16[32,8], index: 5, kind: input, shape index: {}]   ;;  %s2485_s6 = inlined_call_operand.vmem [shape: f32[1,8], index: 6, kind: input, shape index: {}]   ;;  %s2486_s7 = inlined_call_operand.hbm [shape: f32[8,8], index: 7, kind: output, shape index: {}]  }
   0x1   :  { %13 = vsyncpa [#allocation5], 0  ;;  %s20_s26 = sshll.u32 %s2479_s0, 4  ;;  %s21_s26 = int_to_ptr.vmem [resolvable:$true] %s20_s26 }
   0x2   :  { %s2010_s27 = scalar_lea.vmem %s21_s26, 16  ;;  %p2015_p1 = scmp.lt.s32.totalorder %s21_s26, %s21_s26 }
   0x3   :  { %p2011_p0 = scmp.ne.s32.totalorder %s21_s26, %s2010_s27  ;;  %p2016_p2 = scmp.lt.s32.totalorder %s2010_s27, %s2010_s27 }
   0x5   :  { %p2017_p3 = por %p2016_p2, %p2015_p1 }
   0x7   :  { %p2018_p4 = pnand %p2017_p3, %p2011_p0 }
   0x9   :  { %2021 = shalt.err (!%p2018_p4)
}
   0xa   :  { %s2048_s28 = smov [#allocation4]  }
   0xb   :  { %23 = dma.vmem_to_smem %s21_s26, 16, %s2048_s28, [#allocation6]  }
   0xc   :  { %2044 = dma.done.wait [#allocation6], 16  }
   0xd   :  { %2045 = vsyncadd [#allocation6], 4294967280 }
   0xe   :  { %39 = sfence }
   0xf   :  { %v1868_v0 = vld [vmem:[%s2481_s2] sm:$0xff]   ;;  %v2049_v1 = vmov 0.0   ;;  %v1869_v2 = vld [vmem:[%s2481_s2 + $0x8] sm:$0xff]   ;;  %vm2050_vm0 = vmmov 0   ;;  %s41_s9 = sld [smem:[#allocation4]]  ;;  %s1590_s10 = sld [smem:[#allocation4 + $0x1]] }
  0x10   :  { %1709 = vmatprep.subr.bf16.mxu0 %v2049_v1  ;;  %1717 = vmatprep.subr.bf16.mxu1 %v2049_v1  ;;  %s1591_s11 = sld [smem:[#allocation4 + $0x2]]  ;;  %s1592_s12 = sld [smem:[#allocation4 + $0x3]]  ;;  %v2118_v3 = vld [vmem:[%s2482_s3] sm:$0xff]   ;;  %vm44_vm1 = vcmask 253952   ;;  %v2124_v4 = vld [vmem:[%s2482_s3 + $0x8] sm:$0xff]   ;;  %v2051_v13 = vmov 0  }
  0x11   :  { %1710 = vmatpush3.bf16.msra.mxu0 %v1868_v0  ;;  %1713 = vmatprep.mubr.msk.bf16.mxu0 %vm2050_vm0, %v2049_v1  ;;  %s1593_s13 = sld [smem:[#allocation4 + $0x4]]  ;;  %s1594_s14 = sld [smem:[#allocation4 + $0x5]]  ;;  %vm103_vm2 = vcmask 261120   ;;  %v1597_v20 = vld [vmem:[%s2483_s4] ss:$0 sm:$0xff]  ;;  %vm1553_vm3 = vcmask 64512  }
  0x12   :  { %1711 = vmatprep.subr.bf16.mxu0 %v2049_v1  ;;  %1721 = vmatprep.mubr.msk.bf16.mxu1 %vm2050_vm0, %v2049_v1  ;;  %s2111_s15 = sld [smem:[#allocation4 + $0x6]]  ;;  %s2113_s16 = sld [smem:[#allocation4 + $0x7]] }
  0x13   :  { %1718 = vmatpush3.bf16.msra.mxu1 %v2118_v3 }
  0x14   :  { %1719 = vmatprep.subr.bf16.mxu1 %v2049_v1 }
  0x15   :  { %1712 = vmatpush3.bf16.msra.mxu0 %v1869_v2  ;;  %s42_s23 = scalar_lea.vmem %s2480_s1, %s41_s9  ;;  %s47_s26 = scalar_lea.vmem %s2480_s1, %s1590_s10 }
  0x16   :  { %1725 = vmatprep.subr.bf16.mxu0 %v2049_v1  ;;  %v43_v5 = vld [vmem:[%s42_s23] sm:$0x1]  ;;  %s51_s29 = scalar_lea.vmem %s2480_s1, %s1591_s11  ;;  %s55_s8 = scalar_lea.vmem %s2480_s1, %s1592_s12 }
  0x17   :  { %v48_v6 = vld [vmem:[%s47_s26] sm:$0x1]  ;;  %45 = vst.msk [vmem:[#allocation2] sm:$0x1] %vm44_vm1, %v43_v5  ;;  %s59_s17 = scalar_lea.vmem %s2480_s1, %s1593_s13  ;;  %s63_s20 = scalar_lea.vmem %s2480_s1, %s1594_s14  ;;  %1720 = vmatpush3.bf16.msra.mxu1 %v2124_v4 }
  0x18   :  { %49 = vst.msk [vmem:[#allocation2 + $0x1] sm:$0x1] %vm44_vm1, %v48_v6  ;;  %v52_v7 = vld [vmem:[%s51_s29] sm:$0x1]  ;;  %s67_s21 = scalar_lea.vmem %s2480_s1, %s2111_s15  ;;  %s71_s24 = scalar_lea.vmem %s2480_s1, %s2113_s16  ;;  %1733 = vmatprep.subr.bf16.mxu1 %v2049_v1 }
  0x19   :  { %v56_v8 = vld [vmem:[%s55_s8] sm:$0x1]  ;;  %53 = vst.msk [vmem:[#allocation2 + $0x2] sm:$0x1] %vm44_vm1, %v52_v7  ;;  %s2052_s14 = smov 64   ;;  %s2053_s15 = smov 32  }
  0x1a   :  { %57 = vst.msk [vmem:[#allocation2 + $0x3] sm:$0x1] %vm44_vm1, %v56_v8  ;;  %v60_v9 = vld [vmem:[%s59_s17] sm:$0x1]  ;;  %1722 = vmatmul.mubr.bf16.vlgmr.msra.gmra.mrb[0].mxu1 %v2051_v13 }
  0x1b   :  { %v64_v10 = vld [vmem:[%s63_s20] sm:$0x1]  ;;  %61 = vst.msk [vmem:[#allocation2 + $0x4] sm:$0x1] %vm44_vm1, %v60_v9  ;;  %1734 = vmatpush3.bf16.msra.mxu1 %v2118_v3  ;;  %1737 = vmatprep.mubr.msk.bf16.mxu1 %vm2050_vm0, %v2049_v1 }
  0x1c   :  { %65 = vst.msk [vmem:[#allocation2 + $0x5] sm:$0x1] %vm44_vm1, %v64_v10  ;;  %v68_v11 = vld [vmem:[%s67_s21] sm:$0x1]  ;;  %1735 = vmatprep.subr.bf16.mxu1 %v2049_v1 }
  0x1d   :  { %v72_v12 = vld [vmem:[%s71_s24] sm:$0x1]  ;;  %69 = vst.msk [vmem:[#allocation2 + $0x6] sm:$0x1] %vm44_vm1, %v68_v11 }
  0x1e   :  { %73 = vst.msk [vmem:[#allocation2 + $0x7] sm:$0x1] %vm44_vm1, %v72_v12 }
  0x1f   :  { %1736 = vmatpush3.bf16.msra.mxu1 %v2124_v4 }
  0x20   :  { %1749 = vmatprep.subr.bf16.mxu1 %v2049_v1 }
  0x25   :  { %v83_v14 = vld [vmem:[#allocation2] sm:$0xff] }
  0x26   :  { %v84_v15 = vpack.c.bf16 %v83_v14, %v83_v14 }
  0x28   :  { %1714 = vmatmul.mubr.msk.bf16.vlgmr.msra.gmra.mrb[0].mxu0 %vm103_vm2, %v84_v15 }
  0x29   :  { %1726 = vmatpush3.bf16.msra.mxu0 %v2118_v3  ;;  %1729 = vmatprep.mubr.msk.bf16.mxu0 %vm2050_vm0, %v2049_v1 }
  0x2a   :  { %1727 = vmatprep.subr.bf16.mxu0 %v2049_v1 }
  0x2d   :  { %1728 = vmatpush3.bf16.msra.mxu0 %v2124_v4 }
  0x2e   :  { %1741 = vmatprep.subr.bf16.mxu0 %v2049_v1 }
  0xed   :  { %v198_v16 = vpop.f32.mrb[0].mxu1 }
  0xee   :  { %v1723_v17 = vpop.f32.mrb[1].mxu1 }
  0xef   :  { %v201_v18 = vpop.f32.mrb[2].mxu1 }
  0xf0   :  { %v1724_v19 = vpop.f32.mrb[3].mxu1 }
  0xfb   :  { %v141_v21 = vpop.f32.mrb[0].mxu0 }
  0xfc   :  { %v142_v22 = vadd.f32 %v1597_v20, %v141_v21  ;;  %v1715_v23 = vpop.f32.mrb[1].mxu0 }
  0xfd   :  { %v144_v24 = vpop.f32.mrb[2].mxu0 }
  0xfe   :  { %147 = vst [vmem:[#allocation3] sm:$0xff] %v142_v22  ;;  %v1716_v25 = vpop.f32.mrb[3].mxu0 }
 0x105   :  { %v148_v26 = vld [vmem:[#allocation3] sm:$0x1]  ;;  %v234_v43 = vld [vmem:[#allocation3 + $0x1] sm:$0x1]  ;;  %v312_v0 = vld [vmem:[#allocation3 + $0x2] sm:$0x1] }
 0x106   :  { %v204_v27 = vadd.f32 %v198_v16, %v148_v26  ;;  %v390_v25 = vld [vmem:[#allocation3 + $0x3] sm:$0x1] }
 0x108   :  { %1878 = vtanh.f32 %v204_v27  ;;  %v1603_v29 = vmul.f32 -1.442695, %v204_v27 }
 0x10a   :  { %1880 = vpow2.f32 %v1603_v29 }
 0x112   :  { %v1879_v28 = vpop.eup %1878 }
 0x113   :  { %214 = vrot.lane.b32.xlu0 %v1879_v28, %s2052_s14 }
 0x114   :  { %v1881_v30 = vpop.eup %1880 }
 0x115   :  { %v208_v31 = vadd.f32 1.0, %v1881_v30 }
 0x117   :  { %1882 = vrcp.f32 %v208_v31 }
 0x121   :  { %v1883_v32 = vpop.eup %1882 }
 0x122   :  { %v212_v35 = vmul.f32 0.0, %v1883_v32 }
 0x185   :  { %v215_v33 = vpop.permute.xlu0 %214 }
 0x186   :  { %v217_v34 = vmul.f32 %v1883_v32, %v215_v33 }
 0x188   :  { %219 = vrot.lane.b32.xlu0 %v217_v34, %s2053_s15 }
 0x1fa   :  { %v220_v36 = vpop.permute.xlu0 %219 }
 0x1fb   :  { %v222_v37 = vadd.f32 %v220_v36, %v212_v35 }
 0x1fd   :  { %1884 = vtanh.f32 %v222_v37 }
 0x207   :  { %v1885_v38 = vpop.eup %1884 }
 0x208   :  { %225 = vrot.lane.b32.xlu1 %v1885_v38, %s2052_s14 }
 0x27a   :  { %v226_v39 = vpop.permute.xlu1 %225 }
 0x27b   :  { %v2184_v40 = vmul.f32 %v1883_v32, %v226_v39 }
 0x27d   :  { %v235_v41 = vpack.c.bf16 %v2184_v40, %v2184_v40 }
 0x27f   :  { %237 = vrot.lane.b32.xlu1 %v235_v41, %s2053_s15 }
 0x2f1   :  { %v238_v42 = vpop.permute.xlu1 %237 }
 0x2f2   :  { %1730 = vmatmul.mubr.msk.bf16.vlgmr.msra.gmra.mrb[4].mxu0 %vm103_vm2, %v238_v42 }
 0x2f3   :  { %1742 = vmatpush3.bf16.msra.mxu0 %v2118_v3  ;;  %1745 = vmatprep.mubr.msk.bf16.mxu0 %vm2050_vm0, %v2049_v1 }
 0x2f4   :  { %1743 = vmatprep.subr.bf16.mxu0 %v2049_v1 }
 0x2f7   :  { %1744 = vmatpush3.bf16.msra.mxu0 %v2124_v4 }
 0x2f8   :  { %1757 = vmatprep.subr.bf16.mxu0 %v2049_v1 }
 0x3c5   :  { %v276_v44 = vpop.f32.mrb[4].mxu0 }
 0x3c6   :  { %v282_v45 = vadd.f32 %v276_v44, %v234_v43  ;;  %v1731_v46 = vpop.f32.mrb[5].mxu0 }
 0x3c7   :  { %v279_v47 = vpop.f32.mrb[6].mxu0 }
 0x3c8   :  { %1886 = vtanh.f32 %v282_v45  ;;  %v1732_v48 = vpop.f32.mrb[7].mxu0  ;;  %v1605_v50 = vmul.f32 -1.442695, %v282_v45  ;;  %v468_v47 = vld [vmem:[#allocation3 + $0x4] sm:$0x1] }
 0x3ca   :  { %1888 = vpow2.f32 %v1605_v50 }
 0x3d2   :  { %v1887_v49 = vpop.eup %1886 }
 0x3d3   :  { %292 = vrot.lane.b32.xlu0 %v1887_v49, %s2052_s14 }
 0x3d4   :  { %v1889_v51 = vpop.eup %1888 }
 0x3d5   :  { %v286_v52 = vadd.f32 1.0, %v1889_v51 }
 0x3d7   :  { %1890 = vrcp.f32 %v286_v52 }
 0x3e1   :  { %v1891_v53 = vpop.eup %1890 }
 0x3e2   :  { %v290_v56 = vmul.f32 %v1891_v53, %v222_v37 }
 0x445   :  { %v293_v54 = vpop.permute.xlu0 %292 }
 0x446   :  { %v295_v55 = vmul.f32 %v1891_v53, %v293_v54 }
 0x448   :  { %297 = vrot.lane.b32.xlu1 %v295_v55, %s2053_s15 }
 0x4ba   :  { %v298_v57 = vpop.permute.xlu1 %297 }
 0x4bb   :  { %v300_v58 = vadd.f32 %v298_v57, %v290_v56 }
 0x4bd   :  { %1892 = vtanh.f32 %v300_v58 }
 0x4c7   :  { %v1893_v59 = vpop.eup %1892 }
 0x4c8   :  { %303 = vrot.lane.b32.xlu0 %v1893_v59, %s2052_s14 }
 0x53a   :  { %v304_v60 = vpop.permute.xlu0 %303 }
 0x53b   :  { %v2199_v61 = vmul.f32 %v1891_v53, %v304_v60 }
 0x53d   :  { %v313_v62 = vpack.c.bf16 %v2199_v61, %v2199_v61 }
 0x53f   :  { %315 = vrot.lane.b32.xlu1 %v313_v62, %s2053_s15 }
 0x5b1   :  { %v316_v63 = vpop.permute.xlu1 %315 }
 0x5b2   :  { %1738 = vmatmul.mubr.msk.bf16.vlgmr.msra.gmra.mrb[4].mxu1 %vm103_vm2, %v316_v63 }
 0x5b3   :  { %1750 = vmatpush3.bf16.msra.mxu1 %v2118_v3  ;;  %1753 = vmatprep.mubr.msk.bf16.mxu1 %vm2050_vm0, %v2049_v1 }
 0x5b4   :  { %1751 = vmatprep.subr.bf16.mxu1 %v2049_v1 }
 0x5b7   :  { %1752 = vmatpush3.bf16.msra.mxu1 %v2124_v4 }
 0x5b8   :  { %1765 = vmatprep.subr.bf16.mxu1 %v2049_v1 }
 0x685   :  { %v354_v2 = vpop.f32.mrb[4].mxu1 }
 0x686   :  { %v360_v5 = vadd.f32 %v354_v2, %v312_v0  ;;  %v1739_v6 = vpop.f32.mrb[5].mxu1 }
 0x687   :  { %v357_v7 = vpop.f32.mrb[6].mxu1 }
 0x688   :  { %1894 = vtanh.f32 %v360_v5  ;;  %v1740_v8 = vpop.f32.mrb[7].mxu1  ;;  %v1607_v10 = vmul.f32 -1.442695, %v360_v5 }
 0x689   :  { %v546_v8 = vld [vmem:[#allocation3 + $0x5] sm:$0x1] }
 0x68a   :  { %1896 = vpow2.f32 %v1607_v10 }
 0x692   :  { %v1895_v9 = vpop.eup %1894 }
 0x693   :  { %370 = vrot.lane.b32.xlu0 %v1895_v9, %s2052_s14 }
 0x694   :  { %v1897_v11 = vpop.eup %1896 }
 0x695   :  { %v364_v12 = vadd.f32 1.0, %v1897_v11 }
 0x697   :  { %1898 = vrcp.f32 %v364_v12 }
 0x6a1   :  { %v1899_v14 = vpop.eup %1898 }
 0x6a2   :  { %v368_v17 = vmul.f32 %v1899_v14, %v300_v58 }
 0x705   :  { %v371_v15 = vpop.permute.xlu0 %370 }
 0x706   :  { %v373_v16 = vmul.f32 %v1899_v14, %v371_v15 }
 0x708   :  { %375 = vrot.lane.b32.xlu1 %v373_v16, %s2053_s15 }
 0x77a   :  { %v376_v18 = vpop.permute.xlu1 %375 }
 0x77b   :  { %v378_v19 = vadd.f32 %v376_v18, %v368_v17 }
 0x77d   :  { %1900 = vtanh.f32 %v378_v19 }
 0x787   :  { %v1901_v20 = vpop.eup %1900 }
 0x788   :  { %381 = vrot.lane.b32.xlu0 %v1901_v20, %s2052_s14 }
 0x7fa   :  { %v382_v21 = vpop.permute.xlu0 %381 }
 0x7fb   :  { %v2214_v22 = vmul.f32 %v1899_v14, %v382_v21 }
 0x7fd   :  { %v391_v23 = vpack.c.bf16 %v2214_v22, %v2214_v22 }
 0x7ff   :  { %393 = vrot.lane.b32.xlu1 %v391_v23, %s2053_s15 }
 0x871   :  { %v394_v24 = vpop.permute.xlu1 %393 }
 0x872   :  { %1746 = vmatmul.mubr.msk.bf16.vlgmr.msra.gmra.mrb[8].mxu0 %vm103_vm2, %v394_v24 }
 0x873   :  { %1758 = vmatpush3.bf16.msra.mxu0 %v2118_v3  ;;  %1761 = vmatprep.mubr.msk.bf16.mxu0 %vm2050_vm0, %v2049_v1 }
 0x874   :  { %1759 = vmatprep.subr.bf16.mxu0 %v2049_v1 }
 0x877   :  { %1760 = vmatpush3.bf16.msra.mxu0 %v2124_v4 }
 0x878   :  { %1773 = vmatprep.subr.bf16.mxu0 %v2049_v1 }
 0x945   :  { %v432_v26 = vpop.f32.mrb[8].mxu0 }
 0x946   :  { %v438_v27 = vadd.f32 %v432_v26, %v390_v25  ;;  %v1747_v28 = vpop.f32.mrb[9].mxu0 }
 0x947   :  { %v435_v29 = vpop.f32.mrb[10].mxu0 }
 0x948   :  { %1902 = vtanh.f32 %v438_v27  ;;  %v1748_v30 = vpop.f32.mrb[11].mxu0  ;;  %v1609_v32 = vmul.f32 -1.442695, %v438_v27  ;;  %v624_v29 = vld [vmem:[#allocation3 + $0x6] sm:$0x1] }
 0x94a   :  { %1904 = vpow2.f32 %v1609_v32 }
 0x952   :  { %v1903_v31 = vpop.eup %1902 }
 0x953   :  { %448 = vrot.lane.b32.xlu0 %v1903_v31, %s2052_s14 }
 0x954   :  { %v1905_v33 = vpop.eup %1904 }
 0x955   :  { %v442_v34 = vadd.f32 1.0, %v1905_v33 }
 0x957   :  { %1906 = vrcp.f32 %v442_v34 }
 0x961   :  { %v1907_v35 = vpop.eup %1906 }
 0x962   :  { %v446_v38 = vmul.f32 %v1907_v35, %v378_v19 }
 0x9c5   :  { %v449_v36 = vpop.permute.xlu0 %448 }
 0x9c6   :  { %v451_v37 = vmul.f32 %v1907_v35, %v449_v36 }
 0x9c8   :  { %453 = vrot.lane.b32.xlu1 %v451_v37, %s2053_s15 }
 0xa3a   :  { %v454_v39 = vpop.permute.xlu1 %453 }
 0xa3b   :  { %v456_v41 = vadd.f32 %v454_v39, %v446_v38 }
 0xa3d   :  { %1908 = vtanh.f32 %v456_v41 }
 0xa47   :  { %v1909_v42 = vpop.eup %1908 }
 0xa48   :  { %459 = vrot.lane.b32.xlu0 %v1909_v42, %s2052_s14 }
 0xaba   :  { %v460_v43 = vpop.permute.xlu0 %459 }
 0xabb   :  { %v2229_v44 = vmul.f32 %v1907_v35, %v460_v43 }
 0xabd   :  { %v469_v45 = vpack.c.bf16 %v2229_v44, %v2229_v44 }
 0xabf   :  { %471 = vrot.lane.b32.xlu1 %v469_v45, %s2053_s15 }
 0xb31   :  { %v472_v46 = vpop.permute.xlu1 %471 }
 0xb32   :  { %1754 = vmatmul.mubr.msk.bf16.vlgmr.msra.gmra.mrb[8].mxu1 %vm103_vm2, %v472_v46 }
 0xb33   :  { %1766 = vmatpush3.bf16.msra.mxu1 %v2118_v3  ;;  %1769 = vmatprep.mubr.msk.bf16.mxu1 %vm2050_vm0, %v2049_v1 }
 0xb34   :  { %1767 = vmatprep.subr.bf16.mxu1 %v2049_v1 }
 0xb37   :  { %1768 = vmatpush3.bf16.msra.mxu1 %v2124_v4 }
 0xb38   :  { %1781 = vmatprep.subr.bf16.mxu1 %v2049_v1 }
 0xc05   :  { %v510_v48 = vpop.f32.mrb[8].mxu1 }
 0xc06   :  { %v516_v49 = vadd.f32 %v510_v48, %v468_v47  ;;  %v1755_v50 = vpop.f32.mrb[9].mxu1 }
 0xc07   :  { %v513_v51 = vpop.f32.mrb[10].mxu1 }
 0xc08   :  { %1910 = vtanh.f32 %v516_v49  ;;  %v1756_v52 = vpop.f32.mrb[11].mxu1  ;;  %v1611_v54 = vmul.f32 -1.442695, %v516_v49 }
 0xc09   :  { %v702_v52 = vld [vmem:[#allocation3 + $0x7] sm:$0x1] }
 0xc0a   :  { %1912 = vpow2.f32 %v1611_v54 }
 0xc12   :  { %v1911_v53 = vpop.eup %1910 }
 0xc13   :  { %526 = vrot.lane.b32.xlu0 %v1911_v53, %s2052_s14 }
 0xc14   :  { %v1913_v55 = vpop.eup %1912 }
 0xc15   :  { %v520_v56 = vadd.f32 1.0, %v1913_v55 }
 0xc17   :  { %1914 = vrcp.f32 %v520_v56 }
 0xc21   :  { %v1915_v57 = vpop.eup %1914 }
 0xc22   :  { %v524_v60 = vmul.f32 %v1915_v57, %v456_v41 }
 0xc85   :  { %v527_v58 = vpop.permute.xlu0 %526 }
 0xc86   :  { %v529_v59 = vmul.f32 %v1915_v57, %v527_v58 }
 0xc88   :  { %531 = vrot.lane.b32.xlu1 %v529_v59, %s2053_s15 }
 0xcfa   :  { %v532_v62 = vpop.permute.xlu1 %531 }
 0xcfb   :  { %v534_v63 = vadd.f32 %v532_v62, %v524_v60 }
 0xcfd   :  { %1916 = vtanh.f32 %v534_v63 }
 0xd07   :  { %v1917_v0 = vpop.eup %1916 }
 0xd08   :  { %537 = vrot.lane.b32.xlu0 %v1917_v0, %s2052_s14 }
 0xd7a   :  { %v538_v2 = vpop.permute.xlu0 %537 }
 0xd7b   :  { %v2244_v5 = vmul.f32 %v1915_v57, %v538_v2 }
 0xd7d   :  { %v547_v6 = vpack.c.bf16 %v2244_v5, %v2244_v5 }
 0xd7f   :  { %549 = vrot.lane.b32.xlu1 %v547_v6, %s2053_s15 }
 0xdf1   :  { %v550_v7 = vpop.permute.xlu1 %549 }
 0xdf2   :  { %1762 = vmatmul.mubr.msk.bf16.vlgmr.msra.gmra.mrb[12].mxu0 %vm103_vm2, %v550_v7 }
 0xdf3   :  { %1774 = vmatpush3.bf16.msra.mxu0 %v2118_v3  ;;  %1777 = vmatprep.mubr.msk.bf16.mxu0 %vm2050_vm0, %v2049_v1 }
 0xdf4   :  { %1775 = vmatprep.subr.bf16.mxu0 %v2049_v1 }
 0xdf7   :  { %1776 = vmatpush3.bf16.msra.mxu0 %v2124_v4 }
 0xdf8   :  { %1789 = vmatprep.subr.bf16.mxu0 %v2049_v1 }
 0xec5   :  { %v588_v9 = vpop.f32.mrb[12].mxu0 }
 0xec6   :  { %v594_v10 = vadd.f32 %v588_v9, %v546_v8  ;;  %v1763_v11 = vpop.f32.mrb[13].mxu0 }
 0xec7   :  { %v591_v12 = vpop.f32.mrb[14].mxu0 }
 0xec8   :  { %1918 = vtanh.f32 %v594_v10  ;;  %v1764_v14 = vpop.f32.mrb[15].mxu0  ;;  %v1613_v3 = vmul.f32 -1.442695, %v594_v10  ;;  %v1873_v12 = vld [vmem:[%s2481_s2 + $0x18] sm:$0xff]  }
 0xeca   :  { %1920 = vpow2.f32 %v1613_v3 }
 0xed2   :  { %v1919_v15 = vpop.eup %1918 }
 0xed3   :  { %604 = vrot.lane.b32.xlu0 %v1919_v15, %s2052_s14  ;;  %v2311_v15 = vld [vmem:[%s2482_s3 + $0x18] sm:$0xff]  }
 0xed4   :  { %v1921_v16 = vpop.eup %1920 }
 0xed5   :  { %v598_v17 = vadd.f32 1.0, %v1921_v16 }
 0xed7   :  { %1922 = vrcp.f32 %v598_v17 }
 0xee1   :  { %v1923_v18 = vpop.eup %1922 }
 0xee2   :  { %v602_v20 = vmul.f32 %v1923_v18, %v534_v63 }
 0xf45   :  { %v605_v19 = vpop.permute.xlu0 %604 }
 0xf46   :  { %v607_v4 = vmul.f32 %v1923_v18, %v605_v19 }
 0xf48   :  { %609 = vrot.lane.b32.xlu1 %v607_v4, %s2053_s15 }
 0xfba   :  { %v610_v21 = vpop.permute.xlu1 %609 }
 0xfbb   :  { %v612_v23 = vadd.f32 %v610_v21, %v602_v20 }
 0xfbd   :  { %1924 = vtanh.f32 %v612_v23 }
 0xfc7   :  { %v1925_v24 = vpop.eup %1924 }
 0xfc8   :  { %615 = vrot.lane.b32.xlu0 %v1925_v24, %s2052_s14  ;;  %v1627_v24 = vld [vmem:[%s2483_s4 + $0x1] ss:$0 sm:$0xff] }
0x103a   :  { %v616_v25 = vpop.permute.xlu0 %615 }
0x103b   :  { %v2259_v26 = vmul.f32 %v1923_v18, %v616_v25 }
0x103d   :  { %v625_v27 = vpack.c.bf16 %v2259_v26, %v2259_v26 }
0x103f   :  { %627 = vrot.lane.b32.xlu1 %v625_v27, %s2053_s15 }
0x10b1   :  { %v628_v28 = vpop.permute.xlu1 %627 }
0x10b2   :  { %1770 = vmatmul.mubr.msk.bf16.vlgmr.msra.gmra.mrb[12].mxu1 %vm103_vm2, %v628_v28 }
0x10b3   :  { %1785 = vmatprep.mubr.msk.bf16.mxu1 %vm2050_vm0, %v2049_v1 }
0x1185   :  { %v666_v30 = vpop.f32.mrb[12].mxu1 }
0x1186   :  { %v672_v31 = vadd.f32 %v666_v30, %v624_v29  ;;  %v1771_v32 = vpop.f32.mrb[13].mxu1 }
0x1187   :  { %v669_v33 = vpop.f32.mrb[14].mxu1 }
0x1188   :  { %1926 = vtanh.f32 %v672_v31  ;;  %v1772_v34 = vpop.f32.mrb[15].mxu1  ;;  %v1615_v36 = vmul.f32 -1.442695, %v672_v31 }
0x118a   :  { %1928 = vpow2.f32 %v1615_v36 }
0x1192   :  { %v1927_v35 = vpop.eup %1926 }
0x1193   :  { %682 = vrot.lane.b32.xlu0 %v1927_v35, %s2052_s14 }
0x1194   :  { %v1929_v37 = vpop.eup %1928 }
0x1195   :  { %v676_v38 = vadd.f32 1.0, %v1929_v37 }
0x1197   :  { %1930 = vrcp.f32 %v676_v38 }
0x11a1   :  { %v1931_v39 = vpop.eup %1930 }
0x11a2   :  { %v680_v43 = vmul.f32 %v1931_v39, %v612_v23 }
0x1205   :  { %v683_v41 = vpop.permute.xlu0 %682 }
0x1206   :  { %v685_v42 = vmul.f32 %v1931_v39, %v683_v41 }
0x1208   :  { %687 = vrot.lane.b32.xlu1 %v685_v42, %s2053_s15 }
0x127a   :  { %v688_v45 = vpop.permute.xlu1 %687 }
0x127b   :  { %v690_v46 = vadd.f32 %v688_v45, %v680_v43 }
0x127d   :  { %1932 = vtanh.f32 %v690_v46 }
0x1287   :  { %v1933_v47 = vpop.eup %1932 }
0x1288   :  { %693 = vrot.lane.b32.xlu0 %v1933_v47, %s2052_s14 }
0x12fa   :  { %v694_v48 = vpop.permute.xlu0 %693 }
0x12fb   :  { %v696_v49 = vmul.f32 %v1931_v39, %v694_v48 }
0x12fd   :  { %v703_v50 = vpack.c.bf16 %v696_v49, %v696_v49 }
0x12ff   :  { %705 = vrot.lane.b32.xlu1 %v703_v50, %s2053_s15 }
0x1371   :  { %v706_v51 = vpop.permute.xlu1 %705 }
0x1372   :  { %1778 = vmatmul.mubr.msk.bf16.vlgmr.msra.gmra.mrb[16].mxu0 %vm103_vm2, %v706_v51 }
0x1373   :  { %1793 = vmatprep.mubr.msk.bf16.mxu0 %vm2050_vm0, %v2049_v1 }
0x1445   :  { %v744_v53 = vpop.f32.mrb[16].mxu0 }
0x1446   :  { %v750_v54 = vadd.f32 %v744_v53, %v702_v52  ;;  %v1779_v55 = vpop.f32.mrb[17].mxu0 }
0x1447   :  { %v747_v56 = vpop.f32.mrb[18].mxu0 }
0x1448   :  { %1934 = vtanh.f32 %v750_v54  ;;  %v1780_v57 = vpop.f32.mrb[19].mxu0  ;;  %v1617_v59 = vmul.f32 -1.442695, %v750_v54 }
0x144a   :  { %1936 = vpow2.f32 %v1617_v59 }
0x1452   :  { %v1935_v58 = vpop.eup %1934 }
0x1453   :  { %760 = vrot.lane.b32.xlu0 %v1935_v58, %s2052_s14 }
0x1454   :  { %v1937_v60 = vpop.eup %1936 }
0x1455   :  { %v754_v62 = vadd.f32 1.0, %v1937_v60 }
0x1457   :  { %1938 = vrcp.f32 %v754_v62 }
0x1461   :  { %v1939_v63 = vpop.eup %1938 }
0x1462   :  { %v758_v6 = vmul.f32 %v1939_v63, %v690_v46 }
0x14c5   :  { %v761_v0 = vpop.permute.xlu0 %760 }
0x14c6   :  { %v763_v2 = vmul.f32 %v1939_v63, %v761_v0 }
0x14c8   :  { %765 = vrot.lane.b32.xlu1 %v763_v2, %s2053_s15 }
0x14cc   :  { %230 = vrot.lane.b32.xlu1 %v2184_v40, %s2053_s15 }
0x14d0   :  { %386 = vrot.lane.b32.xlu1 %v2214_v22, %s2053_s15 }
0x14d4   :  { %542 = vrot.lane.b32.xlu1 %v2244_v5, %s2053_s15  ;;  %v1872_v5 = vld [vmem:[%s2481_s2 + $0x10] sm:$0xff]  }
0x14d5   :  { %1782 = vmatpush3.bf16.msra.mxu1 %v1872_v5 }
0x14d6   :  { %1783 = vmatprep.subr.bf16.mxu1 %v2049_v1 }
0x14d8   :  { %698 = vrot.lane.b32.xlu1 %v696_v49, %s2053_s15 }
0x14d9   :  { %1784 = vmatpush3.bf16.msra.mxu1 %v1873_v12 }
0x14da   :  { %1797 = vmatprep.subr.bf16.mxu1 %v2049_v1 }
0x153a   :  { %v766_v7 = vpop.permute.xlu1 %765 }
0x153b   :  { %v768_v8 = vadd.f32 %v766_v7, %v758_v6 }
0x153d   :  { %1940 = vtanh.f32 %v768_v8 }
0x153e   :  { %v231_v9 = vpop.permute.xlu1 %230 }
0x153f   :  { %233 = vst.msk [vmem:[#allocation2] sm:$0x1] %vm44_vm1, %v231_v9 }
0x1542   :  { %v387_v10 = vpop.permute.xlu1 %386 }
0x1543   :  { %389 = vst.msk [vmem:[#allocation2 + $0x2] sm:$0x1] %vm44_vm1, %v387_v10 }
0x1546   :  { %v543_v11 = vpop.permute.xlu1 %542 }
0x1547   :  { %v1941_v40 = vpop.eup %1940  ;;  %545 = vst.msk [vmem:[#allocation2 + $0x4] sm:$0x1] %vm44_vm1, %v543_v11 }
0x1548   :  { %771 = vrot.lane.b32.xlu0 %v1941_v40, %s2052_s14 }
0x154a   :  { %v699_v22 = vpop.permute.xlu1 %698 }
0x154b   :  { %701 = vst.msk [vmem:[#allocation2 + $0x6] sm:$0x1] %vm44_vm1, %v699_v22 }
0x154c   :  { %308 = vrot.lane.b32.xlu0 %v2199_v61, %s2053_s15 }
0x1550   :  { %464 = vrot.lane.b32.xlu0 %v2229_v44, %s2053_s15  ;;  %v2305_v44 = vld [vmem:[%s2482_s3 + $0x10] sm:$0xff]  }
0x1551   :  { %1790 = vmatpush3.bf16.msra.mxu0 %v2305_v44 }
0x1552   :  { %1791 = vmatprep.subr.bf16.mxu0 %v2049_v1 }
0x1554   :  { %620 = vrot.lane.b32.xlu0 %v2259_v26, %s2053_s15 }
0x1555   :  { %1792 = vmatpush3.bf16.msra.mxu0 %v2311_v15 }
0x1556   :  { %1805 = vmatprep.subr.bf16.mxu0 %v2049_v1 }
0x1558   :  { %1794 = vmatmul.mubr.bf16.vlgmr.msra.gmra.mrb[20].mxu0 %v2051_v13 }
0x1559   :  { %1806 = vmatpush3.bf16.msra.mxu0 %v2305_v44  ;;  %1809 = vmatprep.mubr.msk.bf16.mxu0 %vm2050_vm0, %v2049_v1 }
0x155a   :  { %1807 = vmatprep.subr.bf16.mxu0 %v2049_v1 }
0x155d   :  { %1808 = vmatpush3.bf16.msra.mxu0 %v2311_v15 }
0x155e   :  { %1821 = vmatprep.subr.bf16.mxu0 %v2049_v1 }
0x15ba   :  { %v772_v61 = vpop.permute.xlu0 %771 }
0x15bb   :  { %v774_v14 = vmul.f32 %v1939_v63, %v772_v61 }
0x15bd   :  { %776 = vrot.lane.b32.xlu0 %v774_v14, %s2053_s15 }
0x15be   :  { %v309_v3 = vpop.permute.xlu0 %308 }
0x15bf   :  { %311 = vst.msk [vmem:[#allocation2 + $0x1] sm:$0x1] %vm44_vm1, %v309_v3 }
0x15c2   :  { %v465_v16 = vpop.permute.xlu0 %464 }
0x15c3   :  { %467 = vst.msk [vmem:[#allocation2 + $0x3] sm:$0x1] %vm44_vm1, %v465_v16 }
0x15c6   :  { %v621_v17 = vpop.permute.xlu0 %620 }
0x15c7   :  { %623 = vst.msk [vmem:[#allocation2 + $0x5] sm:$0x1] %vm44_vm1, %v621_v17 }
0x162b   :  { %v903_v13 = vpop.f32.mrb[20].mxu0 }
0x162c   :  { %v1795_v20 = vpop.f32.mrb[21].mxu0 }
0x162d   :  { %v906_v21 = vpop.f32.mrb[22].mxu0 }
0x162e   :  { %v1796_v23 = vpop.f32.mrb[23].mxu0 }
0x162f   :  { %v777_v18 = vpop.permute.xlu0 %776 }
0x1630   :  { %779 = vst.msk [vmem:[#allocation2 + $0x7] sm:$0x1] %vm44_vm1, %v777_v18 }
0x1637   :  { %v792_v19 = vld [vmem:[#allocation2] sm:$0xff] }
0x1638   :  { %v793_v4 = vpack.c.bf16 %v792_v19, %v792_v19 }
0x163a   :  { %1786 = vmatmul.mubr.msk.bf16.vlgmr.msra.gmra.mrb[16].mxu1 %vm103_vm2, %v793_v4 }
0x163b   :  { %1798 = vmatpush3.bf16.msra.mxu1 %v2305_v44  ;;  %1801 = vmatprep.mubr.msk.bf16.mxu1 %vm2050_vm0, %v2049_v1 }
0x163c   :  { %1799 = vmatprep.subr.bf16.mxu1 %v2049_v1 }
0x163f   :  { %1800 = vmatpush3.bf16.msra.mxu1 %v2311_v15 }
0x1640   :  { %1813 = vmatprep.subr.bf16.mxu1 %v2049_v1 }
0x170d   :  { %v849_v25 = vpop.f32.mrb[16].mxu1 }
0x170e   :  { %v850_v26 = vadd.f32 %v1627_v24, %v849_v25  ;;  %v1787_v27 = vpop.f32.mrb[17].mxu1 }
0x170f   :  { %v852_v28 = vpop.f32.mrb[18].mxu1 }
0x1710   :  { %855 = vst [vmem:[#allocation3] sm:$0xff] %v850_v26  ;;  %v1788_v29 = vpop.f32.mrb[19].mxu1 }
0x1717   :  { %v856_v30 = vld [vmem:[#allocation3] sm:$0x1]  ;;  %v939_v49 = vld [vmem:[#allocation3 + $0x1] sm:$0x1]  ;;  %v1017_v11 = vld [vmem:[#allocation3 + $0x2] sm:$0x1] }
0x1718   :  { %v909_v31 = vadd.f32 %v903_v13, %v856_v30  ;;  %v1095_v28 = vld [vmem:[#allocation3 + $0x3] sm:$0x1] }
0x171a   :  { %1942 = vtanh.f32 %v909_v31  ;;  %v1633_v33 = vmul.f32 -1.442695, %v909_v31 }
0x171c   :  { %1944 = vpow2.f32 %v1633_v33 }
0x1724   :  { %v1943_v32 = vpop.eup %1942 }
0x1725   :  { %919 = vrot.lane.b32.xlu1 %v1943_v32, %s2052_s14 }
0x1726   :  { %v1945_v34 = vpop.eup %1944 }
0x1727   :  { %v913_v35 = vadd.f32 1.0, %v1945_v34 }
0x1729   :  { %1946 = vrcp.f32 %v913_v35 }
0x1733   :  { %v1947_v36 = vpop.eup %1946 }
0x1734   :  { %v917_v39 = vmul.f32 0.0, %v1947_v36 }
0x1797   :  { %v920_v37 = vpop.permute.xlu1 %919 }
0x1798   :  { %v922_v38 = vmul.f32 %v1947_v36, %v920_v37 }
0x179a   :  { %924 = vrot.lane.b32.xlu0 %v922_v38, %s2053_s15 }
0x180c   :  { %v925_v41 = vpop.permute.xlu0 %924 }
0x180d   :  { %v927_v42 = vadd.f32 %v925_v41, %v917_v39 }
0x180f   :  { %1948 = vtanh.f32 %v927_v42 }
0x1819   :  { %v1949_v43 = vpop.eup %1948 }
0x181a   :  { %930 = vrot.lane.b32.xlu1 %v1949_v43, %s2052_s14 }
0x188c   :  { %v931_v45 = vpop.permute.xlu1 %930 }
0x188d   :  { %v2341_v46 = vmul.f32 %v1947_v36, %v931_v45 }
0x188f   :  { %v940_v47 = vpack.c.bf16 %v2341_v46, %v2341_v46 }
0x1891   :  { %942 = vrot.lane.b32.xlu0 %v940_v47, %s2053_s15 }
0x1903   :  { %v943_v48 = vpop.permute.xlu0 %942 }
0x1904   :  { %1802 = vmatmul.mubr.msk.bf16.vlgmr.msra.gmra.mrb[20].mxu1 %vm103_vm2, %v943_v48 }
0x1905   :  { %1814 = vmatpush3.bf16.msra.mxu1 %v2305_v44  ;;  %1817 = vmatprep.mubr.msk.bf16.mxu1 %vm2050_vm0, %v2049_v1 }
0x1906   :  { %1815 = vmatprep.subr.bf16.mxu1 %v2049_v1 }
0x1909   :  { %1816 = vmatpush3.bf16.msra.mxu1 %v2311_v15 }
0x190a   :  { %1829 = vmatprep.subr.bf16.mxu1 %v2049_v1 }
0x19d7   :  { %v981_v50 = vpop.f32.mrb[20].mxu1 }
0x19d8   :  { %v987_v51 = vadd.f32 %v981_v50, %v939_v49  ;;  %v1803_v52 = vpop.f32.mrb[21].mxu1 }
0x19d9   :  { %v984_v53 = vpop.f32.mrb[22].mxu1  ;;  %v1173_v52 = vld [vmem:[#allocation3 + $0x4] sm:$0x1] }
0x19da   :  { %1950 = vtanh.f32 %v987_v51  ;;  %v1804_v54 = vpop.f32.mrb[23].mxu1  ;;  %v1635_v56 = vmul.f32 -1.442695, %v987_v51 }
0x19dc   :  { %1952 = vpow2.f32 %v1635_v56 }
0x19e4   :  { %v1951_v55 = vpop.eup %1950 }
0x19e5   :  { %997 = vrot.lane.b32.xlu1 %v1951_v55, %s2052_s14 }
0x19e6   :  { %v1953_v57 = vpop.eup %1952 }
0x19e7   :  { %v991_v58 = vadd.f32 1.0, %v1953_v57 }
0x19e9   :  { %1954 = vrcp.f32 %v991_v58 }
0x19f3   :  { %v1955_v59 = vpop.eup %1954 }
0x19f4   :  { %v995_v63 = vmul.f32 %v1955_v59, %v927_v42 }
0x1a57   :  { %v998_v60 = vpop.permute.xlu1 %997 }
0x1a58   :  { %v1000_v62 = vmul.f32 %v1955_v59, %v998_v60 }
0x1a5a   :  { %1002 = vrot.lane.b32.xlu0 %v1000_v62, %s2053_s15 }
0x1acc   :  { %v1003_v0 = vpop.permute.xlu0 %1002 }
0x1acd   :  { %v1005_v2 = vadd.f32 %v1003_v0, %v995_v63 }
0x1acf   :  { %1956 = vtanh.f32 %v1005_v2 }
0x1ad9   :  { %v1957_v6 = vpop.eup %1956 }
0x1ada   :  { %1008 = vrot.lane.b32.xlu1 %v1957_v6, %s2052_s14 }
0x1b4c   :  { %v1009_v7 = vpop.permute.xlu1 %1008 }
0x1b4d   :  { %v2356_v8 = vmul.f32 %v1955_v59, %v1009_v7 }
0x1b4f   :  { %v1018_v9 = vpack.c.bf16 %v2356_v8, %v2356_v8 }
0x1b51   :  { %1020 = vrot.lane.b32.xlu0 %v1018_v9, %s2053_s15 }
0x1bc3   :  { %v1021_v10 = vpop.permute.xlu0 %1020 }
0x1bc4   :  { %1810 = vmatmul.mubr.msk.bf16.vlgmr.msra.gmra.mrb[24].mxu0 %vm103_vm2, %v1021_v10 }
0x1bc5   :  { %1822 = vmatpush3.bf16.msra.mxu0 %v2305_v44  ;;  %1825 = vmatprep.mubr.msk.bf16.mxu0 %vm2050_vm0, %v2049_v1 }
0x1bc6   :  { %1823 = vmatprep.subr.bf16.mxu0 %v2049_v1 }
0x1bc9   :  { %1824 = vmatpush3.bf16.msra.mxu0 %v2311_v15 }
0x1bca   :  { %1837 = vmatprep.subr.bf16.mxu0 %v2049_v1 }
0x1c97   :  { %v1059_v40 = vpop.f32.mrb[24].mxu0 }
0x1c98   :  { %v1065_v22 = vadd.f32 %v1059_v40, %v1017_v11  ;;  %v1811_v5 = vpop.f32.mrb[25].mxu0 }
0x1c99   :  { %v1062_v12 = vpop.f32.mrb[26].mxu0 }
0x1c9a   :  { %1958 = vtanh.f32 %v1065_v22  ;;  %v1812_v61 = vpop.f32.mrb[27].mxu0  ;;  %v1637_v3 = vmul.f32 -1.442695, %v1065_v22  ;;  %v1251_v12 = vld [vmem:[#allocation3 + $0x5] sm:$0x1] }
0x1c9c   :  { %1960 = vpow2.f32 %v1637_v3 }
0x1ca4   :  { %v1959_v14 = vpop.eup %1958 }
0x1ca5   :  { %1075 = vrot.lane.b32.xlu1 %v1959_v14, %s2052_s14 }
0x1ca6   :  { %v1961_v16 = vpop.eup %1960 }
0x1ca7   :  { %v1069_v17 = vadd.f32 1.0, %v1961_v16 }
0x1ca9   :  { %1962 = vrcp.f32 %v1069_v17 }
0x1cb3   :  { %v1963_v18 = vpop.eup %1962 }
0x1cb4   :  { %v1073_v13 = vmul.f32 %v1963_v18, %v1005_v2 }
0x1d17   :  { %v1076_v19 = vpop.permute.xlu1 %1075 }
0x1d18   :  { %v1078_v4 = vmul.f32 %v1963_v18, %v1076_v19 }
0x1d1a   :  { %1080 = vrot.lane.b32.xlu0 %v1078_v4, %s2053_s15 }
0x1d8c   :  { %v1081_v20 = vpop.permute.xlu0 %1080 }
0x1d8d   :  { %v1083_v21 = vadd.f32 %v1081_v20, %v1073_v13 }
0x1d8f   :  { %1964 = vtanh.f32 %v1083_v21 }
0x1d99   :  { %v1965_v23 = vpop.eup %1964 }
0x1d9a   :  { %1086 = vrot.lane.b32.xlu1 %v1965_v23, %s2052_s14 }
0x1e0c   :  { %v1087_v24 = vpop.permute.xlu1 %1086 }
0x1e0d   :  { %v2371_v25 = vmul.f32 %v1963_v18, %v1087_v24 }
0x1e0f   :  { %v1096_v26 = vpack.c.bf16 %v2371_v25, %v2371_v25 }
0x1e11   :  { %1098 = vrot.lane.b32.xlu0 %v1096_v26, %s2053_s15 }
0x1e83   :  { %v1099_v27 = vpop.permute.xlu0 %1098 }
0x1e84   :  { %1818 = vmatmul.mubr.msk.bf16.vlgmr.msra.gmra.mrb[24].mxu1 %vm103_vm2, %v1099_v27 }
0x1e85   :  { %1830 = vmatpush3.bf16.msra.mxu1 %v2305_v44  ;;  %1833 = vmatprep.mubr.msk.bf16.mxu1 %vm2050_vm0, %v2049_v1 }
0x1e86   :  { %1831 = vmatprep.subr.bf16.mxu1 %v2049_v1 }
0x1e89   :  { %1832 = vmatpush3.bf16.msra.mxu1 %v2311_v15 }
0x1e8a   :  { %1845 = vmatprep.subr.bf16.mxu1 %v2049_v1 }
0x1f57   :  { %v1137_v29 = vpop.f32.mrb[24].mxu1 }
0x1f58   :  { %v1143_v30 = vadd.f32 %v1137_v29, %v1095_v28  ;;  %v1819_v31 = vpop.f32.mrb[25].mxu1 }
0x1f59   :  { %v1140_v32 = vpop.f32.mrb[26].mxu1  ;;  %v1329_v31 = vld [vmem:[#allocation3 + $0x6] sm:$0x1] }
0x1f5a   :  { %1966 = vtanh.f32 %v1143_v30  ;;  %v1820_v33 = vpop.f32.mrb[27].mxu1  ;;  %v1639_v35 = vmul.f32 -1.442695, %v1143_v30 }
0x1f5c   :  { %1968 = vpow2.f32 %v1639_v35 }
0x1f64   :  { %v1967_v34 = vpop.eup %1966 }
0x1f65   :  { %1153 = vrot.lane.b32.xlu1 %v1967_v34, %s2052_s14 }
0x1f66   :  { %v1969_v36 = vpop.eup %1968 }
0x1f67   :  { %v1147_v37 = vadd.f32 1.0, %v1969_v36 }
0x1f69   :  { %1970 = vrcp.f32 %v1147_v37 }
0x1f73   :  { %v1971_v38 = vpop.eup %1970 }
0x1f74   :  { %v1151_v42 = vmul.f32 %v1971_v38, %v1083_v21 }
0x1fd7   :  { %v1154_v39 = vpop.permute.xlu1 %1153 }
0x1fd8   :  { %v1156_v41 = vmul.f32 %v1971_v38, %v1154_v39 }
0x1fda   :  { %1158 = vrot.lane.b32.xlu0 %v1156_v41, %s2053_s15 }
0x204c   :  { %v1159_v43 = vpop.permute.xlu0 %1158 }
0x204d   :  { %v1161_v45 = vadd.f32 %v1159_v43, %v1151_v42 }
0x204f   :  { %1972 = vtanh.f32 %v1161_v45 }
0x2059   :  { %v1973_v47 = vpop.eup %1972 }
0x205a   :  { %1164 = vrot.lane.b32.xlu1 %v1973_v47, %s2052_s14 }
0x20cc   :  { %v1165_v48 = vpop.permute.xlu1 %1164 }
0x20cd   :  { %v2386_v49 = vmul.f32 %v1971_v38, %v1165_v48 }
0x20cf   :  { %v1174_v50 = vpack.c.bf16 %v2386_v49, %v2386_v49 }
0x20d1   :  { %1176 = vrot.lane.b32.xlu0 %v1174_v50, %s2053_s15 }
0x2143   :  { %v1177_v51 = vpop.permute.xlu0 %1176 }
0x2144   :  { %1826 = vmatmul.mubr.msk.bf16.vlgmr.msra.gmra.mrb[28].mxu0 %vm103_vm2, %v1177_v51 }
0x2145   :  { %1838 = vmatpush3.bf16.msra.mxu0 %v2305_v44  ;;  %1841 = vmatprep.mubr.msk.bf16.mxu0 %vm2050_vm0, %v2049_v1 }
0x2146   :  { %1839 = vmatprep.subr.bf16.mxu0 %v2049_v1 }
0x2149   :  { %1840 = vmatpush3.bf16.msra.mxu0 %v2311_v15 }
0x214a   :  { %1853 = vmatprep.subr.bf16.mxu0 %v2049_v1 }
0x2217   :  { %v1215_v53 = vpop.f32.mrb[28].mxu0 }
0x2218   :  { %v1221_v54 = vadd.f32 %v1215_v53, %v1173_v52  ;;  %v1827_v55 = vpop.f32.mrb[29].mxu0 }
0x2219   :  { %v1218_v56 = vpop.f32.mrb[30].mxu0 }
0x221a   :  { %1974 = vtanh.f32 %v1221_v54  ;;  %v1828_v57 = vpop.f32.mrb[31].mxu0  ;;  %v1641_v59 = vmul.f32 -1.442695, %v1221_v54  ;;  %v1407_v56 = vld [vmem:[#allocation3 + $0x7] sm:$0x1] }
0x221c   :  { %1976 = vpow2.f32 %v1641_v59 }
0x2224   :  { %v1975_v58 = vpop.eup %1974 }
0x2225   :  { %1231 = vrot.lane.b32.xlu1 %v1975_v58, %s2052_s14 }
0x2226   :  { %v1977_v60 = vpop.eup %1976 }
0x2227   :  { %v1225_v62 = vadd.f32 1.0, %v1977_v60 }
0x2229   :  { %1978 = vrcp.f32 %v1225_v62 }
0x2233   :  { %v1979_v63 = vpop.eup %1978 }
0x2234   :  { %v1229_v6 = vmul.f32 %v1979_v63, %v1161_v45 }
0x2297   :  { %v1232_v0 = vpop.permute.xlu1 %1231 }
0x2298   :  { %v1234_v2 = vmul.f32 %v1979_v63, %v1232_v0 }
0x229a   :  { %1236 = vrot.lane.b32.xlu0 %v1234_v2, %s2053_s15 }
0x230c   :  { %v1237_v7 = vpop.permute.xlu0 %1236 }
0x230d   :  { %v1239_v9 = vadd.f32 %v1237_v7, %v1229_v6 }
0x230f   :  { %1980 = vtanh.f32 %v1239_v9 }
0x2319   :  { %v1981_v10 = vpop.eup %1980 }
0x231a   :  { %1242 = vrot.lane.b32.xlu1 %v1981_v10, %s2052_s14 }
0x238c   :  { %v1243_v11 = vpop.permute.xlu1 %1242 }
0x238d   :  { %v2401_v40 = vmul.f32 %v1979_v63, %v1243_v11 }
0x238f   :  { %v1252_v22 = vpack.c.bf16 %v2401_v40, %v2401_v40 }
0x2391   :  { %1254 = vrot.lane.b32.xlu0 %v1252_v22, %s2053_s15 }
0x2403   :  { %v1255_v5 = vpop.permute.xlu0 %1254 }
0x2404   :  { %1834 = vmatmul.mubr.msk.bf16.vlgmr.msra.gmra.mrb[28].mxu1 %vm103_vm2, %v1255_v5 }
0x2405   :  { %1846 = vmatpush3.bf16.msra.mxu1 %v2305_v44  ;;  %1849 = vmatprep.mubr.msk.bf16.mxu1 %vm2050_vm0, %v2049_v1 }
0x2406   :  { %1847 = vmatprep.subr.bf16.mxu1 %v2049_v1 }
0x2409   :  { %1848 = vmatpush3.bf16.msra.mxu1 %v2311_v15 }
0x24d7   :  { %v1293_v61 = vpop.f32.mrb[28].mxu1 }
0x24d8   :  { %v1299_v14 = vadd.f32 %v1293_v61, %v1251_v12  ;;  %v1835_v3 = vpop.f32.mrb[29].mxu1 }
0x24d9   :  { %v1296_v16 = vpop.f32.mrb[30].mxu1  ;;  %v1877_v3 = vld [vmem:[%s2484_s5 + $0x8] sm:$0xff]  }
0x24da   :  { %1982 = vtanh.f32 %v1299_v14  ;;  %v1836_v17 = vpop.f32.mrb[31].mxu1  ;;  %v1643_v19 = vmul.f32 -1.442695, %v1299_v14 }
0x24dc   :  { %1984 = vpow2.f32 %v1643_v19 }
0x24e4   :  { %v1983_v18 = vpop.eup %1982 }
0x24e5   :  { %1309 = vrot.lane.b32.xlu1 %v1983_v18, %s2052_s14 }
0x24e6   :  { %v1985_v44 = vpop.eup %1984 }
0x24e7   :  { %v1303_v4 = vadd.f32 1.0, %v1985_v44 }
0x24e9   :  { %1986 = vrcp.f32 %v1303_v4 }
0x24f3   :  { %v1987_v13 = vpop.eup %1986 }
0x24f4   :  { %v1307_v15 = vmul.f32 %v1987_v13, %v1239_v9 }
0x2557   :  { %v1310_v20 = vpop.permute.xlu1 %1309 }
0x2558   :  { %v1312_v21 = vmul.f32 %v1987_v13, %v1310_v20 }
0x255a   :  { %1314 = vrot.lane.b32.xlu0 %v1312_v21, %s2053_s15 }
0x25cc   :  { %v1315_v23 = vpop.permute.xlu0 %1314 }
0x25cd   :  { %v1317_v24 = vadd.f32 %v1315_v23, %v1307_v15 }
0x25cf   :  { %1988 = vtanh.f32 %v1317_v24 }
0x25d9   :  { %v1989_v26 = vpop.eup %1988 }
0x25da   :  { %1320 = vrot.lane.b32.xlu1 %v1989_v26, %s2052_s14 }
0x264c   :  { %v1321_v27 = vpop.permute.xlu1 %1320 }
0x264d   :  { %v2415_v28 = vmul.f32 %v1987_v13, %v1321_v27 }
0x264f   :  { %v1330_v29 = vpack.c.bf16 %v2415_v28, %v2415_v28 }
0x2651   :  { %1332 = vrot.lane.b32.xlu0 %v1330_v29, %s2053_s15 }
0x26c3   :  { %v1333_v30 = vpop.permute.xlu0 %1332 }
0x26c4   :  { %1842 = vmatmul.mubr.msk.bf16.vlgmr.msra.gmra.mrb[32].mxu0 %vm103_vm2, %v1333_v30 }
0x26c5   :  { %1857 = vmatprep.mubr.msk.bf16.mxu0 %vm2050_vm0, %v2049_v1 }
0x2797   :  { %v1371_v32 = vpop.f32.mrb[32].mxu0 }
0x2798   :  { %v1377_v33 = vadd.f32 %v1371_v32, %v1329_v31  ;;  %v1843_v34 = vpop.f32.mrb[33].mxu0 }
0x2799   :  { %v1374_v35 = vpop.f32.mrb[34].mxu0 }
0x279a   :  { %1990 = vtanh.f32 %v1377_v33  ;;  %v1844_v36 = vpop.f32.mrb[35].mxu0  ;;  %v1645_v38 = vmul.f32 -1.442695, %v1377_v33 }
0x279c   :  { %1992 = vpow2.f32 %v1645_v38 }
0x27a4   :  { %v1991_v37 = vpop.eup %1990 }
0x27a5   :  { %1387 = vrot.lane.b32.xlu1 %v1991_v37, %s2052_s14 }
0x27a6   :  { %v1993_v39 = vpop.eup %1992 }
0x27a7   :  { %v1381_v41 = vadd.f32 1.0, %v1993_v39 }
0x27a9   :  { %1994 = vrcp.f32 %v1381_v41 }
0x27b3   :  { %v1995_v42 = vpop.eup %1994 }
0x27b4   :  { %v1385_v47 = vmul.f32 %v1995_v42, %v1317_v24 }
0x2817   :  { %v1388_v43 = vpop.permute.xlu1 %1387 }
0x2818   :  { %v1390_v45 = vmul.f32 %v1995_v42, %v1388_v43 }
0x281a   :  { %1392 = vrot.lane.b32.xlu0 %v1390_v45, %s2053_s15 }
0x288c   :  { %v1393_v48 = vpop.permute.xlu0 %1392 }
0x288d   :  { %v1395_v50 = vadd.f32 %v1393_v48, %v1385_v47 }
0x288f   :  { %1996 = vtanh.f32 %v1395_v50 }
0x2899   :  { %v1997_v51 = vpop.eup %1996 }
0x289a   :  { %1398 = vrot.lane.b32.xlu1 %v1997_v51, %s2052_s14 }
0x290c   :  { %v1399_v52 = vpop.permute.xlu1 %1398 }
0x290d   :  { %v1401_v53 = vmul.f32 %v1995_v42, %v1399_v52 }
0x290f   :  { %v1408_v54 = vpack.c.bf16 %v1401_v53, %v1401_v53 }
0x2911   :  { %1410 = vrot.lane.b32.xlu0 %v1408_v54, %s2053_s15 }
0x2983   :  { %v1411_v55 = vpop.permute.xlu0 %1410 }
0x2984   :  { %1850 = vmatmul.mubr.msk.bf16.vlgmr.msra.gmra.mrb[32].mxu1 %vm103_vm2, %v1411_v55 }
0x2a57   :  { %v1449_v57 = vpop.f32.mrb[32].mxu1 }
0x2a58   :  { %v1455_v58 = vadd.f32 %v1449_v57, %v1407_v56  ;;  %v1851_v59 = vpop.f32.mrb[33].mxu1 }
0x2a59   :  { %v1452_v60 = vpop.f32.mrb[34].mxu1 }
0x2a5a   :  { %1998 = vtanh.f32 %v1455_v58  ;;  %v1852_v62 = vpop.f32.mrb[35].mxu1  ;;  %v1647_v0 = vmul.f32 -1.442695, %v1455_v58 }
0x2a5c   :  { %2000 = vpow2.f32 %v1647_v0 }
0x2a64   :  { %v1999_v63 = vpop.eup %1998 }
0x2a65   :  { %1465 = vrot.lane.b32.xlu1 %v1999_v63, %s2052_s14 }
0x2a66   :  { %v2001_v2 = vpop.eup %2000 }
0x2a67   :  { %v1459_v6 = vadd.f32 1.0, %v2001_v2 }
0x2a69   :  { %2002 = vrcp.f32 %v1459_v6 }
0x2a73   :  { %v2003_v7 = vpop.eup %2002 }
0x2a74   :  { %v1463_v11 = vmul.f32 %v2003_v7, %v1395_v50 }
0x2ad7   :  { %v1466_v9 = vpop.permute.xlu1 %1465 }
0x2ad8   :  { %v1468_v10 = vmul.f32 %v2003_v7, %v1466_v9 }
0x2ada   :  { %1470 = vrot.lane.b32.xlu0 %v1468_v10, %s2053_s15 }
0x2ade   :  { %935 = vrot.lane.b32.xlu0 %v2341_v46, %s2053_s15 }
0x2ae2   :  { %1091 = vrot.lane.b32.xlu0 %v2371_v25, %s2053_s15 }
0x2ae6   :  { %1247 = vrot.lane.b32.xlu0 %v2401_v40, %s2053_s15  ;;  %v1876_v40 = vld [vmem:[%s2484_s5] sm:$0xff]  }
0x2ae7   :  { %1854 = vmatpush3.bf16.msra.mxu0 %v1876_v40 }
0x2ae8   :  { %1855 = vmatprep.subr.bf16.mxu0 %v2049_v1  ;;  %v1648_v1 = vld [vmem:[%s2485_s6] ss:$0 sm:$0xff]  ;;  %s2054_s6 = smov [#allocation7]  }
0x2ae9   :  { %s1573_s18 = sshll.u32 %s2054_s6, 4  ;;  %s1574_s18 = int_to_ptr.vmem [resolvable:$true] %s1573_s18 }
0x2aea   :  { %1403 = vrot.lane.b32.xlu0 %v1401_v53, %s2053_s15  ;;  %s2022_s19 = scalar_lea.vmem %s1574_s18, 128  ;;  %p2027_p6 = scmp.lt.s32.totalorder %s1574_s18, %s1574_s18 }
0x2aeb   :  { %1856 = vmatpush3.bf16.msra.mxu0 %v1877_v3  ;;  %p2023_p5 = scmp.ne.s32.totalorder %s1574_s18, %s2022_s19  ;;  %p2028_p7 = scmp.lt.s32.totalorder %s2022_s19, %s2022_s19 }
0x2aed   :  { %p2029_p8 = por %p2028_p7, %p2027_p6 }
0x2aef   :  { %p2030_p9 = pnand %p2029_p8, %p2023_p5 }
0x2b4c   :  { %v1471_v22 = vpop.permute.xlu0 %1470 }
0x2b4d   :  { %v1473_v5 = vadd.f32 %v1471_v22, %v1463_v11 }
0x2b4f   :  { %2004 = vtanh.f32 %v1473_v5 }
0x2b50   :  { %v936_v12 = vpop.permute.xlu0 %935 }
0x2b51   :  { %938 = vst.msk [vmem:[#allocation2] sm:$0x1] %vm44_vm1, %v936_v12 }
0x2b54   :  { %v1092_v61 = vpop.permute.xlu0 %1091 }
0x2b55   :  { %1094 = vst.msk [vmem:[#allocation2 + $0x2] sm:$0x1] %vm44_vm1, %v1092_v61 }
0x2b58   :  { %v1248_v14 = vpop.permute.xlu0 %1247 }
0x2b59   :  { %v2005_v46 = vpop.eup %2004  ;;  %1250 = vst.msk [vmem:[#allocation2 + $0x4] sm:$0x1] %vm44_vm1, %v1248_v14 }
0x2b5a   :  { %1476 = vrot.lane.b32.xlu1 %v2005_v46, %s2052_s14 }
0x2b5c   :  { %v1404_v25 = vpop.permute.xlu0 %1403 }
0x2b5d   :  { %1406 = vst.msk [vmem:[#allocation2 + $0x6] sm:$0x1] %vm44_vm1, %v1404_v25 }
0x2b5e   :  { %1013 = vrot.lane.b32.xlu1 %v2356_v8, %s2053_s15 }
0x2b62   :  { %1169 = vrot.lane.b32.xlu1 %v2386_v49, %s2053_s15 }
0x2b66   :  { %1325 = vrot.lane.b32.xlu1 %v2415_v28, %s2053_s15 }
0x2bcc   :  { %v1477_v16 = vpop.permute.xlu1 %1476 }
0x2bcd   :  { %v1479_v8 = vmul.f32 %v2003_v7, %v1477_v16 }
0x2bcf   :  { %1481 = vrot.lane.b32.xlu1 %v1479_v8, %s2053_s15 }
0x2bd0   :  { %v1014_v49 = vpop.permute.xlu1 %1013 }
0x2bd1   :  { %1016 = vst.msk [vmem:[#allocation2 + $0x1] sm:$0x1] %vm44_vm1, %v1014_v49 }
0x2bd4   :  { %v1170_v17 = vpop.permute.xlu1 %1169 }
0x2bd5   :  { %1172 = vst.msk [vmem:[#allocation2 + $0x3] sm:$0x1] %vm44_vm1, %v1170_v17 }
0x2bd8   :  { %v1326_v18 = vpop.permute.xlu1 %1325 }
0x2bd9   :  { %1328 = vst.msk [vmem:[#allocation2 + $0x5] sm:$0x1] %vm44_vm1, %v1326_v18 }
0x2c41   :  { %v1482_v19 = vpop.permute.xlu1 %1481 }
0x2c42   :  { %1484 = vst.msk [vmem:[#allocation2 + $0x7] sm:$0x1] %vm44_vm1, %v1482_v19 }
0x2c49   :  { %v1485_v44 = vld [vmem:[#allocation2] sm:$0xff] }
0x2c4a   :  { %v1486_v4 = vpack.c.bf16 %v1485_v44, %v1485_v44 }
0x2c4c   :  { %1858 = vmatmul.mubr.msk.bf16.vlgmr.msra.gmra.mrb[36].mxu0 %vm103_vm2, %v1486_v4 }
0x2d1f   :  { %v1547_v13 = vpop.f32.mrb[36].mxu0 }
0x2d20   :  { %v1548_v20 = vadd.f32 %v1648_v1, %v1547_v13  ;;  %v1859_v21 = vpop.f32.mrb[37].mxu0 }
0x2d21   :  { %v1550_v15 = vpop.f32.mrb[38].mxu0 }
0x2d22   :  { %v1860_v23 = vpop.f32.mrb[39].mxu0  ;;  %v1554_v24 = vsel %vm1553_vm3, %v1548_v20, -inf }
0x2d23   :  { %1555 = vmax.xlane.f32.xlu0 %v1554_v24 }
0x2db0   :  { %v1556_v26 = vpop.xlane.xlu0 %1555 }
0x2db1   :  { %v1557_v27 = vsub.f32 %v1548_v20, %v1556_v26 }
0x2db3   :  { %v1558_v28 = vmul.f32 1.442695, %v1557_v27 }
0x2db5   :  { %2006 = vpow2.f32 %v1558_v28 }
0x2dbf   :  { %v2007_v29 = vpop.eup %2006 }
0x2dc0   :  { %v1560_v30 = vsel %vm1553_vm3, %v2007_v29, 0.0 }
0x2dc1   :  { %1561 = vadd.xlane.f32.xlu1 %v1560_v30 }
0x2e4e   :  { %v1562_v31 = vpop.xlane.xlu1 %1561 }
0x2e4f   :  { %2008 = vlog2.f32 %v1562_v31 }
0x2e59   :  { %v2009_v32 = vpop.eup %2008 }
0x2e5a   :  { %v1564_v33 = vmul.f32 0.6931472, %v2009_v32 }
0x2e5c   :  { %v1565_v34 = vsub.f32 %v1557_v27, %v1564_v33 }
0x2e5e   :  { %1566 = vst.msk [vmem:[#allocation7] sm:$0xff] %vm1553_vm3, %v1565_v34 }
0x2e5f   :  { %2033 = shalt.err (!%p2030_p9)
}
0x2e60   :  { %s2034_s12 = scalar_lea.hbm %s2486_s7, 128 }
0x2e61   :  { %p2035_p10 = scmp.ne.s32.totalorder %s2486_s7, %s2034_s12  ;;  %p2038_p11 = scmp.lt.u32.totalorder %s2034_s12, %s2486_s7 }
0x2e63   :  { %p2040_p12 = pnand %p2038_p11, %p2035_p10 }
0x2e65   :  { %2043 = shalt.err (!%p2040_p12)
}
0x2e66   :  { %1576 = dma.vmem_to_hbm [thread:$0]  %s1574_s18, 128, %s2486_s7, [#allocation5]  }
0x2e67   :  { %2046 = dma.done.wait [#allocation5], 128  }
0x2e68   :  { %2047 = vsyncadd [#allocation5], 4294967168 }
0x2e69   :  { %1580 = vsyncpa [#allocation5], 1 }
0x2e6a   :  { %1581 = vsyncpa [#allocation6], 1 }

</bundles_post_ra>
